<compile_context>
chip_gen: v7x
topology: tpu7x:2x2x1
jax: 0.10.0
libtpu: 0.0.40
codegen_flags: <defaults>
</compile_context>

<pallas_src>
import jax
import jax.numpy as jnp
from jax.experimental import pallas as pl
from jax.experimental.pallas import tpu as pltpu

EMBED_DIM = 32          # stands in for CLIP-L's 1024
MLP_HIDDEN = int(4.0)   # faithful to MMFuser: MultiLayerPerceptron(D, int(4.0), D)
PROJ_DIM = 16           # stands in for projection_dim (768)
PATCH = 4
LN_EPS = 1e-5           # nn.LayerNorm default
_INV_SQRT2 = 0.7071067811865476
_NEG_BIG = -1e30        # flash-attention running-max init (avoid inf arithmetic)


# ----------------------------- shared helpers -------------------------------

def _layernorm(v, w, b):
    mu = jnp.mean(v, axis=-1, keepdims=True)
    var = jnp.mean(jnp.square(v - mu), axis=-1, keepdims=True)
    return (v - mu) * jax.lax.rsqrt(var + LN_EPS) * w + b


def _gelu_exact(x):
    # nn.GELU() default (erf-based)
    return 0.5 * x * (1.0 + jax.lax.erf(x * _INV_SQRT2))


def _dot_nt(a, b):
    # [M,K] x [N,K] -> [M,N]  (x @ W^T / Q @ K^T, no materialized transpose)
    return jax.lax.dot_general(a, b, (((1,), (1,)), ((), ())),
                               preferred_element_type=jnp.float32)


def _dot_nn(a, b):
    # [M,K] x [K,N] -> [M,N]
    return jax.lax.dot_general(a, b, (((1,), (0,)), ((), ())),
                               preferred_element_type=jnp.float32)


def _round_up(x, m):
    return (x + m - 1) // m * m


# --------------------- packed f32 vector-parameter layout -------------------
# All rows width D, zero padded.  Matrix blocks start at multiples of 8 rows so
# static slices never cross an (8,128) tile boundary.

def _vec_layout(h):
    lay = {"LN1W": 0, "LN1B": 1, "LN2W": 2, "LN2B": 3,
           "LN3W": 4, "LN3B": 5, "G1": 6, "G2": 7,
           "FC2B": 8, "PROJB": 9, "FCW": 10, "FCB": 11}
    lay["FC1W"] = _round_up(12, 8)              # h rows
    lay["FC1B"] = lay["FC1W"] + h               # h rows, bias value in lane 0
    lay["FC2WT"] = _round_up(lay["FC1B"] + h, 8)  # h rows (fc2_w^T)
    lay["ROWS"] = _round_up(lay["FC2WT"] + h, 8)
    return lay


def _pack_vec_params(p):
    d = int(p["ln1_w"].shape[0])
    h = int(p["fc1_w"].shape[0])
    lay = _vec_layout(h)
    pv = jnp.zeros((lay["ROWS"], d), jnp.float32)

    def row(v):
        v = jnp.asarray(v, jnp.float32).reshape(-1)
        return jnp.pad(v, (0, d - v.shape[0]))

    pv = pv.at[lay["LN1W"]].set(row(p["ln1_w"]))
    pv = pv.at[lay["LN1B"]].set(row(p["ln1_b"]))
    pv = pv.at[lay["LN2W"]].set(row(p["ln2_w"]))
    pv = pv.at[lay["LN2B"]].set(row(p["ln2_b"]))
    pv = pv.at[lay["LN3W"]].set(row(p["ln3_w"]))
    pv = pv.at[lay["LN3B"]].set(row(p["ln3_b"]))
    pv = pv.at[lay["G1"]].set(row(p["gamma1"]))
    pv = pv.at[lay["G2"]].set(row(p["gamma2"]))
    pv = pv.at[lay["FC2B"]].set(row(p["fc2_b"]))
    pv = pv.at[lay["PROJB"]].set(row(p["proj_b"]))
    pv = pv.at[lay["FCW"]].set(row(p["fc_w"]))
    pv = pv.at[lay["FCB"], 0].set(jnp.asarray(p["fc_b"], jnp.float32)[0])
    pv = pv.at[lay["FC1W"]:lay["FC1W"] + h, :].set(p["fc1_w"].astype(jnp.float32))
    pv = pv.at[lay["FC1B"]:lay["FC1B"] + h, 0].set(p["fc1_b"].astype(jnp.float32))
    pv = pv.at[lay["FC2WT"]:lay["FC2WT"] + h, :].set(p["fc2_w"].T.astype(jnp.float32))
    return pv


# -------------------------------- fused kernel -------------------------------

def _make_kernel(n_chunks, h, pd, lay):
    f32, b16 = jnp.float32, jnp.bfloat16

    def kernel(*refs):
        kv_refs = refs[:n_chunks]                 # each [P_c, D] bf16 (batch squeezed)
        q_ref = refs[n_chunks]                    # [Sq, D] bf16
        pvec = refs[n_chunks + 1]                 # [R, D] f32 packed params
        projw_ref = refs[n_chunks + 2]            # [Pd, D] bf16
        visual_ref, emb_ref, logit_ref = refs[n_chunks + 3:]

        sq, d = q_ref.shape
        scale = d ** -0.5

        ln1w = pvec[lay["LN1W"]:lay["LN1W"] + 1, :]
        ln1b = pvec[lay["LN1B"]:lay["LN1B"] + 1, :]
        ln2w = pvec[lay["LN2W"]:lay["LN2W"] + 1, :]
        ln2b = pvec[lay["LN2B"]:lay["LN2B"] + 1, :]
        ln3w = pvec[lay["LN3W"]:lay["LN3W"] + 1, :]
        ln3b = pvec[lay["LN3B"]:lay["LN3B"] + 1, :]
        g1 = pvec[lay["G1"]:lay["G1"] + 1, :]
        g2 = pvec[lay["G2"]:lay["G2"] + 1, :]
        fc2b = pvec[lay["FC2B"]:lay["FC2B"] + 1, :]
        projb = pvec[lay["PROJB"]:lay["PROJB"] + 1, 0:pd]
        fcw = pvec[lay["FCW"]:lay["FCW"] + 1, 0:pd]
        fcb = pvec[lay["FCB"]:lay["FCB"] + 1, 0:1]

        # norm2(query); 1/sqrt(D) folded into the query before the bf16 cast.
        norm_f = _layernorm(q_ref[...].astype(f32), ln2w, ln2b)
        q_b = (norm_f * scale).astype(b16)

        # ---- cross attention: flash-style running accumulation over chunks ----
        m = jnp.full((sq, 1), _NEG_BIG, f32)
        l = jnp.zeros((sq, 1), f32)
        acc = jnp.zeros((sq, d), f32)
        for kv_ref in kv_refs:
            nx = _layernorm(kv_ref[...].astype(f32), ln1w, ln1b)
            nx_b = nx.astype(b16)
            s = _dot_nt(q_b, nx_b)                              # [Sq, P_c] f32
            m_new = jnp.maximum(m, s.max(axis=-1, keepdims=True))
            alpha = jnp.exp(m - m_new)
            p = jnp.exp(s - m_new)
            l = alpha * l + p.sum(axis=-1, keepdims=True)
            acc = alpha * acc + _dot_nn(p.astype(b16), nx_b)
            m = m_new
        # exact reciprocal (approx EUP rcp + Newton is the perf option; exact
        # keeps the validation tight and is a [Sq,1] op either way).
        attn = acc * (1.0 / l)

        # ---- MLP (hidden = 4) as rank-1 VPU/XLU updates, dropout p=0 = id ----
        cross = jnp.zeros((sq, d), f32)
        for j in range(h):
            w1j = pvec[lay["FC1W"] + j:lay["FC1W"] + j + 1, :]        # [1, D]
            b1j = pvec[lay["FC1B"] + j:lay["FC1B"] + j + 1, 0:1]      # [1, 1]
            hj = jnp.sum(attn * w1j, axis=-1, keepdims=True) + b1j    # [Sq, 1]
            gj = _gelu_exact(hj)
            w2j = pvec[lay["FC2WT"] + j:lay["FC2WT"] + j + 1, :]      # [1, D]
            cross = cross + gj * w2j
        cross = cross + fc2b

        # ---- self attention on norm3(cross) ----
        norm_c = _layernorm(cross, ln3w, ln3b)
        nc_b = norm_c.astype(b16)
        s2 = _dot_nt((norm_c * scale).astype(b16), nc_b)
        p2 = jnp.exp(s2 - s2.max(axis=-1, keepdims=True))
        sa = _dot_nn(p2.astype(b16), nc_b) * (1.0 / p2.sum(axis=-1, keepdims=True))

        visual = norm_f + g2 * (cross + g1 * sa)
        visual_ref[...] = visual.astype(visual_ref.dtype)

        # ---- head: visual_projection -> L2 normalize -> token mean -> fc ----
        proj = _dot_nt(visual.astype(b16), projw_ref[...]) + projb    # [Sq, Pd]
        # TODO(synk): torch .norm(p=2) has no eps; an all-zero row NaNs in both
        # the PyTorch original and here.
        emb = proj * jax.lax.rsqrt(jnp.sum(jnp.square(proj), axis=-1, keepdims=True))
        emb_ref[...] = emb.astype(emb_ref.dtype)

        pooled = jnp.mean(emb, axis=0, keepdims=True)                 # [1, Pd]
        logit = jnp.sum(pooled * fcw, axis=-1, keepdims=True) + fcb   # [1, 1]
        # lane-dense padded store; wrapper slices [:, 0, :1]
        logit_ref[...] = (logit + jnp.zeros(logit_ref.shape, f32)).astype(logit_ref.dtype)

    return kernel


def deeclip_fused(kv_feats, query_feature, params):
    """kv_feats: list of [B, P_c, D] earlier-layer features (never concatenated in HBM)."""
    b, sq, d = (int(x) for x in query_feature.shape)
    h = int(params["fc1_w"].shape[0])
    pd = int(params["proj_w"].shape[0])
    lay = _vec_layout(h)

    pvec = _pack_vec_params(params)                        # f32 [R, D]
    projw = params["proj_w"].astype(jnp.bfloat16)          # bf16 [Pd, D]
    kv_b = [f.astype(jnp.bfloat16) for f in kv_feats]      # bf16 across the boundary
    q_b = query_feature.astype(jnp.bfloat16)

    n_chunks = len(kv_feats)
    kernel = _make_kernel(n_chunks, h, pd, lay)

    kv_specs = [pl.BlockSpec((None, int(f.shape[1]), d), lambda i: (i, 0, 0))
                for f in kv_feats]
    in_specs = kv_specs + [
        pl.BlockSpec((None, sq, d), lambda i: (i, 0, 0)),
        pl.BlockSpec((lay["ROWS"], d), lambda i: (0, 0)),   # constant block -> single DMA
        pl.BlockSpec((pd, d), lambda i: (0, 0)),            # constant block -> single DMA
    ]
    out_specs = (
        pl.BlockSpec((None, sq, d), lambda i: (i, 0, 0)),
        pl.BlockSpec((None, sq, pd), lambda i: (i, 0, 0)),
        pl.BlockSpec((None, 8, 128), lambda i: (i, 0, 0)),
    )
    out_shape = (
        jax.ShapeDtypeStruct((b, sq, d), jnp.float32),      # visual_feature
        jax.ShapeDtypeStruct((b, sq, pd), jnp.float32),     # image_embeds
        jax.ShapeDtypeStruct((b, 8, 128), jnp.float32),     # padded logits
    )

    skv = sum(int(f.shape[1]) for f in kv_feats)
    flops = 2 * b * sq * d * (2 * skv + 2 * sq + 2 * h + pd)
    transcendentals = b * sq * (skv + sq + h)
    bytes_accessed = (sum(int(x.size) * x.dtype.itemsize for x in kv_b)
                      + int(q_b.size) * 2 + int(pvec.size) * 4 + int(projw.size) * 2
                      + b * sq * d * 4 + b * sq * pd * 4 + b * 8 * 128 * 4)

    visual, emb, logit_pad = pl.pallas_call(
        kernel,
        grid=(b,),
        in_specs=in_specs,
        out_specs=out_specs,
        out_shape=out_shape,
        compiler_params=pltpu.CompilerParams(
            dimension_semantics=("parallel",),              # v7x: split batch over 2 TCs
            vmem_limit_bytes=48 * 1024 * 1024),
        cost_estimate=pl.CostEstimate(flops=int(flops),
                                      transcendentals=int(transcendentals),
                                      bytes_accessed=int(bytes_accessed)),
    )(*kv_b, q_b, pvec, projw)
    return visual, emb, logit_pad[:, 0, :1]


# ----------------------------- mocked CLIP backbone --------------------------

def mock_clip_hidden_states(images, p):
    # TODO(synk): pretrained CLIP-ViT + LoRA backbone is not translatable without
    # its checkpoint; deterministic synthetic patch-embed + residual stack instead,
    # producing hidden_states with a CLS token ([B, 1+P, D]) as feature_select expects.
    B, C, H, W = images.shape
    ph, pw = H // PATCH, W // PATCH
    patches = images.reshape(B, C, ph, PATCH, pw, PATCH)
    patches = patches.transpose(0, 2, 4, 1, 3, 5).reshape(B, ph * pw, C * PATCH * PATCH)
    x = patches @ p["embed_w"] + p["embed_b"]
    cls = jnp.broadcast_to(p["cls_token"], (B, 1, EMBED_DIM))
    h = jnp.concatenate([cls, x], axis=1)
    hidden_states = [h]
    for wl in p["layer_ws"]:
        h = h + jnp.tanh(h @ wl)
        hidden_states.append(h)
    return hidden_states


def deeclip_forward(images, params, layer_indices=(1, 2, 3), train=True):
    hidden_states = mock_clip_hidden_states(images, params)
    # feature_select with list layer_indices and select_feature='patch' (drop CLS)
    feats = [hidden_states[i][:, 1:] for i in layer_indices]
    visual_feature, image_embeds, logits = deeclip_fused(feats[:-1], feats[-1], params)
    if train:
        return image_embeds, logits
    return feats, visual_feature, logits


# ------------------------------- params & refs -------------------------------

def init_params(key):
    D = EMBED_DIM
    ks = jax.random.split(key, 10)
    patch_dim = 3 * PATCH * PATCH
    f32 = jnp.float32
    return {
        # mocked backbone
        "embed_w": jax.random.normal(ks[0], (patch_dim, D), f32) * 0.05,
        "embed_b": jnp.zeros((D,), f32),
        "cls_token": jax.random.normal(ks[1], (1, D), f32) * 0.02,
        "layer_ws": jax.random.normal(ks[2], (3, D, D), f32) * 0.05,
        # MMFuser
        "ln1_w": jnp.ones((D,), f32), "ln1_b": jnp.zeros((D,), f32),
        "ln2_w": jnp.ones((D,), f32), "ln2_b": jnp.zeros((D,), f32),
        "ln3_w": jnp.ones((D,), f32), "ln3_b": jnp.zeros((D,), f32),
        "gamma1": jnp.ones((D,), f32), "gamma2": jnp.ones((D,), f32),
        "fc1_w": jax.random.normal(ks[3], (MLP_HIDDEN, D), f32) / jnp.sqrt(D).astype(f32),
        "fc1_b": jax.random.normal(ks[4], (MLP_HIDDEN,), f32) * 0.01,
        "fc2_w": jax.random.normal(ks[5], (D, MLP_HIDDEN), f32) / jnp.sqrt(MLP_HIDDEN).astype(f32),
        "fc2_b": jax.random.normal(ks[6], (D,), f32) * 0.01,
        # visual_projection (xavier-uniform-scale) and fc (normal 0.02)
        "proj_w": jax.random.normal(ks[7], (PROJ_DIM, D), f32) * jnp.sqrt(2.0 / (D + PROJ_DIM)).astype(f32),
        "proj_b": jnp.zeros((PROJ_DIM,), f32),
        "fc_w": jax.random.normal(ks[8], (1, PROJ_DIM), f32) * 0.02,
        "fc_b": jnp.zeros((1,), f32),
    }


def reference_matched(kv_list, query, p):
    """Pure-JAX/XLA reference mirroring the kernel's numerics (bf16 MXU operands,
    f32 accumulation/elementwise, chunked online softmax, same fold points)."""
    f32, b16 = jnp.float32, jnp.bfloat16
    hi = jax.lax.Precision.HIGHEST
    d = query.shape[-1]
    scale = d ** -0.5
    norm_f = _layernorm(query.astype(f32), p["ln2_w"], p["ln2_b"])
    q_b = (norm_f * scale).astype(b16)
    shp = norm_f.shape[:-1] + (1,)
    m = jnp.full(shp, _NEG_BIG, f32)
    l = jnp.zeros(shp, f32)
    acc = jnp.zeros(norm_f.shape, f32)
    for kv in kv_list:
        nx = _layernorm(kv.astype(f32), p["ln1_w"], p["ln1_b"])
        nx_b = nx.astype(b16)
        s = jnp.einsum("bqd,bkd->bqk", q_b, nx_b, preferred_element_type=f32)
        m_new = jnp.maximum(m, s.max(-1, keepdims=True))
        alpha = jnp.exp(m - m_new)
        pr = jnp.exp(s - m_new)
        l = alpha * l + pr.sum(-1, keepdims=True)
        acc = alpha * acc + jnp.einsum("bqk,bkd->bqd", pr.astype(b16), nx_b,
                                       preferred_element_type=f32)
        m = m_new
    attn = acc * (1.0 / l)
    h1 = _gelu_exact(jnp.einsum("bqd,hd->bqh", attn, p["fc1_w"], precision=hi)
                     + p["fc1_b"])
    cross = jnp.einsum("bqh,dh->bqd", h1, p["fc2_w"], precision=hi) + p["fc2_b"]
    nc = _layernorm(cross, p["ln3_w"], p["ln3_b"])
    s2 = jnp.einsum("bqd,bkd->bqk", (nc * scale).astype(b16), nc.astype(b16),
                    preferred_element_type=f32)
    p2 = jnp.exp(s2 - s2.max(-1, keepdims=True))
    sa = jnp.einsum("bqk,bkd->bqd", p2.astype(b16), nc.astype(b16),
                    preferred_element_type=f32) * (1.0 / p2.sum(-1, keepdims=True))
    visual = norm_f + p["gamma2"] * (cross + p["gamma1"] * sa)
    proj = jnp.einsum("bqd,pd->bqp", visual.astype(b16), p["proj_w"].astype(b16),
                      preferred_element_type=f32) + p["proj_b"]
    emb = proj * jax.lax.rsqrt(jnp.sum(jnp.square(proj), -1, keepdims=True))
    logits = jnp.sum(emb.mean(axis=1) * p["fc_w"][0], axis=-1, keepdims=True) + p["fc_b"]
    return visual, emb, logits


def reference_torch_f32(input_features, query_feature, p):
    """Torch-faithful f32 reference (direct K/V concat) for a structural sanity check."""
    def softmax(s):
        s = s - s.max(-1, keepdims=True)
        e = jnp.exp(s)
        return e / e.sum(-1, keepdims=True)

    D = input_features.shape[-1]
    scale = D ** -0.5
    norm_x = _layernorm(input_features, p["ln1_w"], p["ln1_b"])
    norm_f = _layernorm(query_feature, p["ln2_w"], p["ln2_b"])
    s = jnp.einsum("bqd,bkd->bqk", norm_f, norm_x) * scale
    attn = jnp.einsum("bqk,bkd->bqd", softmax(s), norm_x)
    h = _gelu_exact(attn @ p["fc1_w"].T + p["fc1_b"])
    cross = h @ p["fc2_w"].T + p["fc2_b"]
    nc = _layernorm(cross, p["ln3_w"], p["ln3_b"])
    s2 = jnp.einsum("bqd,bkd->bqk", nc, nc) * scale
    sa = jnp.einsum("bqk,bkd->bqd", softmax(s2), nc)
    visual = norm_f + p["gamma2"] * (cross + p["gamma1"] * sa)
    proj = visual @ p["proj_w"].T + p["proj_b"]
    emb = proj / jnp.linalg.norm(proj, axis=-1, keepdims=True)
    logits = emb.mean(axis=1) @ p["fc_w"].T + p["fc_b"]
    return emb, logits


# ------------------------------------ main -----------------------------------

if __name__ == "__main__":
    key = jax.random.PRNGKey(0)
    k_img, k_par = jax.random.split(key)
    images = jax.random.normal(k_img, (2, 3, 16, 16), jnp.float32)   # NCHW like PyTorch
    params = init_params(k_par)

    image_embeds, logits = deeclip_forward(images, params, train=True)
    jax.block_until_ready((image_embeds, logits))

    hidden_states = mock_clip_hidden_states(images, params)
    feats = [hidden_states[i][:, 1:] for i in (1, 2, 3)]

    # (a) tight check vs. a reference with identical (bf16-MXU / f32-elementwise)
    #     numerics and the same bf16-rounded inputs as the Pallas path.
    kv_b = [f.astype(jnp.bfloat16) for f in feats[:-1]]
    q_b = feats[-1].astype(jnp.bfloat16)
    _, emb_m, logits_m = reference_matched(kv_b, q_b, params)
    # (b) loose sanity check vs. the torch-faithful f32 reference (bounds the
    #     bf16-operand deviation from the original f32 semantics).
    emb_f, logits_f = reference_torch_f32(
        jnp.concatenate(feats[:-1], axis=1), feats[-1], params)

    ok = (image_embeds.shape == (2, 16, PROJ_DIM)
          and logits.shape == (2, 1)
          and bool(jnp.all(jnp.isfinite(image_embeds)))
          and bool(jnp.allclose(image_embeds, emb_m, atol=5e-3, rtol=5e-3))
          and bool(jnp.allclose(logits, logits_m, atol=5e-3, rtol=5e-3))
          and bool(jnp.allclose(image_embeds, emb_f, atol=1e-1, rtol=1e-1))
          and bool(jnp.allclose(logits, logits_f, atol=1e-1, rtol=1e-1)))

    if ok:
        print("KERNEL_OK")
    else:
        err_m = float(jnp.max(jnp.abs(image_embeds - emb_m)))
        err_f = float(jnp.max(jnp.abs(image_embeds - emb_f)))
        raise SystemExit(f"mismatch: max|emb - matched_ref|={err_m:.3e}, "
                         f"max|emb - f32_ref|={err_f:.3e}")
</pallas_src>

<mosaic_0001>
module attributes {stable_mosaic.version = 11 : i64} {
  func.func @kernel(%arg0: i32, %arg1: memref<1x16x32xbf16, #tpu.memory_space<vmem>>, %arg2: memref<1x16x32xbf16, #tpu.memory_space<vmem>>, %arg3: memref<1x16x32xbf16, #tpu.memory_space<vmem>>, %arg4: memref<32x32xf32, #tpu.memory_space<vmem>>, %arg5: memref<16x32xbf16, #tpu.memory_space<vmem>>, %arg6: memref<1x16x32xf32, #tpu.memory_space<vmem>>, %arg7: memref<1x16x16xf32, #tpu.memory_space<vmem>>, %arg8: memref<1x8x128xf32, #tpu.memory_space<vmem>>) attributes {dimension_semantics = [#tpu.dimension_semantics<parallel>], iteration_bounds = array<i64: 2>, scalar_prefetch = 0 : i64, scratch_operands = 0 : i64, tpu.core_type = #tpu.core_type<tc>, window_params = [{transform_indices = @transform_0, window_bounds = array<i64: 1, 16, 32>}, {transform_indices = @transform_1, window_bounds = array<i64: 1, 16, 32>}, {transform_indices = @transform_2, window_bounds = array<i64: 1, 16, 32>}, {pipeline_mode = #tpu.pipeline_mode<synchronous>, transform_indices = @transform_3, window_bounds = array<i64: 32, 32>}, {pipeline_mode = #tpu.pipeline_mode<synchronous>, transform_indices = @transform_4, window_bounds = array<i64: 16, 32>}, {transform_indices = @transform_5, window_bounds = array<i64: 1, 16, 32>}, {transform_indices = @transform_6, window_bounds = array<i64: 1, 16, 16>}, {transform_indices = @transform_7, window_bounds = array<i64: 1, 8, 128>}]} {
    %c0 = arith.constant 0 : index
    %c0_0 = arith.constant 0 : index
    %0 = vector.load %arg4[%c0, %c0_0] : memref<32x32xf32, #tpu.memory_space<vmem>>, vector<1x32xf32>
    %c1 = arith.constant 1 : index
    %c0_1 = arith.constant 0 : index
    %1 = vector.load %arg4[%c1, %c0_1] : memref<32x32xf32, #tpu.memory_space<vmem>>, vector<1x32xf32>
    %c2 = arith.constant 2 : index
    %c0_2 = arith.constant 0 : index
    %2 = vector.load %arg4[%c2, %c0_2] : memref<32x32xf32, #tpu.memory_space<vmem>>, vector<1x32xf32>
    %c3 = arith.constant 3 : index
    %c0_3 = arith.constant 0 : index
    %3 = vector.load %arg4[%c3, %c0_3] : memref<32x32xf32, #tpu.memory_space<vmem>>, vector<1x32xf32>
    %c4 = arith.constant 4 : index
    %c0_4 = arith.constant 0 : index
    %4 = vector.load %arg4[%c4, %c0_4] : memref<32x32xf32, #tpu.memory_space<vmem>>, vector<1x32xf32>
    %c5 = arith.constant 5 : index
    %c0_5 = arith.constant 0 : index
    %5 = vector.load %arg4[%c5, %c0_5] : memref<32x32xf32, #tpu.memory_space<vmem>>, vector<1x32xf32>
    %c6 = arith.constant 6 : index
    %c0_6 = arith.constant 0 : index
    %6 = vector.load %arg4[%c6, %c0_6] : memref<32x32xf32, #tpu.memory_space<vmem>>, vector<1x32xf32>
    %c7 = arith.constant 7 : index
    %c0_7 = arith.constant 0 : index
    %7 = vector.load %arg4[%c7, %c0_7] : memref<32x32xf32, #tpu.memory_space<vmem>>, vector<1x32xf32>
    %c8 = arith.constant 8 : index
    %c0_8 = arith.constant 0 : index
    %8 = vector.load %arg4[%c8, %c0_8] : memref<32x32xf32, #tpu.memory_space<vmem>>, vector<1x32xf32>
    %c9 = arith.constant 9 : index
    %c0_9 = arith.constant 0 : index
    %9 = vector.load %arg4[%c9, %c0_9] : memref<32x32xf32, #tpu.memory_space<vmem>>, vector<1x16xf32>
    %c10 = arith.constant 10 : index
    %c0_10 = arith.constant 0 : index
    %10 = vector.load %arg4[%c10, %c0_10] : memref<32x32xf32, #tpu.memory_space<vmem>>, vector<1x16xf32>
    %c11 = arith.constant 11 : index
    %c0_11 = arith.constant 0 : index
    %11 = vector.load %arg4[%c11, %c0_11] : memref<32x32xf32, #tpu.memory_space<vmem>>, vector<1x1xf32>
    %c0_12 = arith.constant 0 : index
    %c0_13 = arith.constant 0 : index
    %c0_14 = arith.constant 0 : index
    %12 = vector.load %arg3[%c0_12, %c0_13, %c0_14] : memref<1x16x32xbf16, #tpu.memory_space<vmem>>, vector<1x16x32xbf16>
    %13 = vector.shape_cast %12 : vector<1x16x32xbf16> to vector<16x32xbf16>
    %14 = arith.extf %13 : vector<16x32xbf16> to vector<16x32xf32>
    %cst = arith.constant dense<0.000000e+00> : vector<16xf32>
    %15 = vector.multi_reduction <add>, %14, %cst [1] : vector<16x32xf32> to vector<16xf32>
    %16 = vector.shape_cast %15 : vector<16xf32> to vector<16x1xf32>
    %cst_15 = arith.constant 3.200000e+01 : f32
    %17 = vector.broadcast %cst_15 : f32 to vector<16x1xf32>
    %18 = arith.divf %16, %17 : vector<16x1xf32>
    %19 = vector.broadcast %18 : vector<16x1xf32> to vector<16x32xf32>
    %20 = arith.subf %14, %19 : vector<16x32xf32>
    %21 = arith.mulf %20, %20 : vector<16x32xf32>
    %cst_16 = arith.constant dense<0.000000e+00> : vector<16xf32>
    %22 = vector.multi_reduction <add>, %21, %cst_16 [1] : vector<16x32xf32> to vector<16xf32>
    %23 = vector.shape_cast %22 : vector<16xf32> to vector<16x1xf32>
    %cst_17 = arith.constant 3.200000e+01 : f32
    %24 = vector.broadcast %cst_17 : f32 to vector<16x1xf32>
    %25 = arith.divf %23, %24 : vector<16x1xf32>
    %26 = vector.broadcast %18 : vector<16x1xf32> to vector<16x32xf32>
    %27 = arith.subf %14, %26 : vector<16x32xf32>
    %cst_18 = arith.constant 9.99999974E-6 : f32
    %28 = vector.broadcast %cst_18 : f32 to vector<16x1xf32>
    %29 = arith.addf %25, %28 : vector<16x1xf32>
    %30 = math.rsqrt %29 : vector<16x1xf32>
    %31 = vector.broadcast %30 : vector<16x1xf32> to vector<16x32xf32>
    %32 = arith.mulf %27, %31 : vector<16x32xf32>
    %33 = vector.broadcast %2 : vector<1x32xf32> to vector<16x32xf32>
    %34 = arith.mulf %32, %33 : vector<16x32xf32>
    %35 = vector.broadcast %3 : vector<1x32xf32> to vector<16x32xf32>
    %36 = arith.addf %34, %35 : vector<16x32xf32>
    %cst_19 = arith.constant 0.176776692 : f32
    %37 = vector.broadcast %cst_19 : f32 to vector<16x32xf32>
    %38 = arith.mulf %36, %37 : vector<16x32xf32>
    %39 = arith.truncf %38 : vector<16x32xf32> to vector<16x32xbf16>
    %cst_20 = arith.constant -1.000000e+30 : f32
    %40 = vector.broadcast %cst_20 : f32 to vector<16x1xf32>
    %cst_21 = arith.constant 0.000000e+00 : f32
    %41 = vector.broadcast %cst_21 : f32 to vector<16x1xf32>
    %cst_22 = arith.constant 0.000000e+00 : f32
    %42 = vector.broadcast %cst_22 : f32 to vector<16x32xf32>
    %c0_23 = arith.constant 0 : index
    %c0_24 = arith.constant 0 : index
    %c0_25 = arith.constant 0 : index
    %43 = vector.load %arg1[%c0_23, %c0_24, %c0_25] : memref<1x16x32xbf16, #tpu.memory_space<vmem>>, vector<1x16x32xbf16>
    %44 = vector.shape_cast %43 : vector<1x16x32xbf16> to vector<16x32xbf16>
    %45 = arith.extf %44 : vector<16x32xbf16> to vector<16x32xf32>
    %cst_26 = arith.constant dense<0.000000e+00> : vector<16xf32>
    %46 = vector.multi_reduction <add>, %45, %cst_26 [1] : vector<16x32xf32> to vector<16xf32>
    %47 = vector.shape_cast %46 : vector<16xf32> to vector<16x1xf32>
    %cst_27 = arith.constant 3.200000e+01 : f32
    %48 = vector.broadcast %cst_27 : f32 to vector<16x1xf32>
    %49 = arith.divf %47, %48 : vector<16x1xf32>
    %50 = vector.broadcast %49 : vector<16x1xf32> to vector<16x32xf32>
    %51 = arith.subf %45, %50 : vector<16x32xf32>
    %52 = arith.mulf %51, %51 : vector<16x32xf32>
    %cst_28 = arith.constant dense<0.000000e+00> : vector<16xf32>
    %53 = vector.multi_reduction <add>, %52, %cst_28 [1] : vector<16x32xf32> to vector<16xf32>
    %54 = vector.shape_cast %53 : vector<16xf32> to vector<16x1xf32>
    %cst_29 = arith.constant 3.200000e+01 : f32
    %55 = vector.broadcast %cst_29 : f32 to vector<16x1xf32>
    %56 = arith.divf %54, %55 : vector<16x1xf32>
    %57 = vector.broadcast %49 : vector<16x1xf32> to vector<16x32xf32>
    %58 = arith.subf %45, %57 : vector<16x32xf32>
    %cst_30 = arith.constant 9.99999974E-6 : f32
    %59 = vector.broadcast %cst_30 : f32 to vector<16x1xf32>
    %60 = arith.addf %56, %59 : vector<16x1xf32>
    %61 = math.rsqrt %60 : vector<16x1xf32>
    %62 = vector.broadcast %61 : vector<16x1xf32> to vector<16x32xf32>
    %63 = arith.mulf %58, %62 : vector<16x32xf32>
    %64 = vector.broadcast %0 : vector<1x32xf32> to vector<16x32xf32>
    %65 = arith.mulf %63, %64 : vector<16x32xf32>
    %66 = vector.broadcast %1 : vector<1x32xf32> to vector<16x32xf32>
    %67 = arith.addf %65, %66 : vector<16x32xf32>
    %68 = arith.truncf %67 : vector<16x32xf32> to vector<16x32xbf16>
    %cst_31 = arith.constant dense<0.000000e+00> : vector<16x16xf32>
    %69 = tpu.matmul %39, %68, %cst_31 {dimension_numbers = #tpu.dot_dimension_numbers<[1], [1], [0], [0], [0, 0, 1, 0], [], []>} : vector<16x32xbf16>, vector<16x32xbf16>, vector<16x16xf32> -> vector<16x16xf32>
    %cst_32 = arith.constant dense<0xFF800000> : vector<16xf32>
    %70 = vector.multi_reduction <maximumf>, %69, %cst_32 [1] : vector<16x16xf32> to vector<16xf32>
    %71 = vector.shape_cast %70 : vector<16xf32> to vector<16x1xf32>
    %72 = arith.maximumf %40, %71 : vector<16x1xf32>
    %73 = arith.subf %40, %72 : vector<16x1xf32>
    %74 = math.exp %73 : vector<16x1xf32>
    %75 = vector.broadcast %72 : vector<16x1xf32> to vector<16x16xf32>
    %76 = arith.subf %69, %75 : vector<16x16xf32>
    %77 = math.exp %76 : vector<16x16xf32>
    %78 = arith.mulf %74, %41 : vector<16x1xf32>
    %cst_33 = arith.constant dense<0.000000e+00> : vector<16xf32>
    %79 = vector.multi_reduction <add>, %77, %cst_33 [1] : vector<16x16xf32> to vector<16xf32>
    %80 = vector.shape_cast %79 : vector<16xf32> to vector<16x1xf32>
    %81 = arith.addf %78, %80 : vector<16x1xf32>
    %82 = vector.broadcast %74 : vector<16x1xf32> to vector<16x32xf32>
    %83 = arith.mulf %82, %42 : vector<16x32xf32>
    %84 = arith.truncf %77 : vector<16x16xf32> to vector<16x16xbf16>
    %cst_34 = arith.constant dense<0.000000e+00> : vector<16x32xf32>
    %85 = tpu.matmul %84, %68, %cst_34 {dimension_numbers = #tpu.dot_dimension_numbers<[1], [0], [0], [1], [0, 0, 1, 1], [], []>} : vector<16x16xbf16>, vector<16x32xbf16>, vector<16x32xf32> -> vector<16x32xf32>
    %86 = arith.addf %83, %85 : vector<16x32xf32>
    %c0_35 = arith.constant 0 : index
    %c0_36 = arith.constant 0 : index
    %c0_37 = arith.constant 0 : index
    %87 = vector.load %arg2[%c0_35, %c0_36, %c0_37] : memref<1x16x32xbf16, #tpu.memory_space<vmem>>, vector<1x16x32xbf16>
    %88 = vector.shape_cast %87 : vector<1x16x32xbf16> to vector<16x32xbf16>
    %89 = arith.extf %88 : vector<16x32xbf16> to vector<16x32xf32>
    %cst_38 = arith.constant dense<0.000000e+00> : vector<16xf32>
    %90 = vector.multi_reduction <add>, %89, %cst_38 [1] : vector<16x32xf32> to vector<16xf32>
    %91 = vector.shape_cast %90 : vector<16xf32> to vector<16x1xf32>
    %cst_39 = arith.constant 3.200000e+01 : f32
    %92 = vector.broadcast %cst_39 : f32 to vector<16x1xf32>
    %93 = arith.divf %91, %92 : vector<16x1xf32>
    %94 = vector.broadcast %93 : vector<16x1xf32> to vector<16x32xf32>
    %95 = arith.subf %89, %94 : vector<16x32xf32>
    %96 = arith.mulf %95, %95 : vector<16x32xf32>
    %cst_40 = arith.constant dense<0.000000e+00> : vector<16xf32>
    %97 = vector.multi_reduction <add>, %96, %cst_40 [1] : vector<16x32xf32> to vector<16xf32>
    %98 = vector.shape_cast %97 : vector<16xf32> to vector<16x1xf32>
    %cst_41 = arith.constant 3.200000e+01 : f32
    %99 = vector.broadcast %cst_41 : f32 to vector<16x1xf32>
    %100 = arith.divf %98, %99 : vector<16x1xf32>
    %101 = vector.broadcast %93 : vector<16x1xf32> to vector<16x32xf32>
    %102 = arith.subf %89, %101 : vector<16x32xf32>
    %cst_42 = arith.constant 9.99999974E-6 : f32
    %103 = vector.broadcast %cst_42 : f32 to vector<16x1xf32>
    %104 = arith.addf %100, %103 : vector<16x1xf32>
    %105 = math.rsqrt %104 : vector<16x1xf32>
    %106 = vector.broadcast %105 : vector<16x1xf32> to vector<16x32xf32>
    %107 = arith.mulf %102, %106 : vector<16x32xf32>
    %108 = vector.broadcast %0 : vector<1x32xf32> to vector<16x32xf32>
    %109 = arith.mulf %107, %108 : vector<16x32xf32>
    %110 = vector.broadcast %1 : vector<1x32xf32> to vector<16x32xf32>
    %111 = arith.addf %109, %110 : vector<16x32xf32>
    %112 = arith.truncf %111 : vector<16x32xf32> to vector<16x32xbf16>
    %cst_43 = arith.constant dense<0.000000e+00> : vector<16x16xf32>
    %113 = tpu.matmul %39, %112, %cst_43 {dimension_numbers = #tpu.dot_dimension_numbers<[1], [1], [0], [0], [0, 0, 1, 0], [], []>} : vector<16x32xbf16>, vector<16x32xbf16>, vector<16x16xf32> -> vector<16x16xf32>
    %cst_44 = arith.constant dense<0xFF800000> : vector<16xf32>
    %114 = vector.multi_reduction <maximumf>, %113, %cst_44 [1] : vector<16x16xf32> to vector<16xf32>
    %115 = vector.shape_cast %114 : vector<16xf32> to vector<16x1xf32>
    %116 = arith.maximumf %72, %115 : vector<16x1xf32>
    %117 = arith.subf %72, %116 : vector<16x1xf32>
    %118 = math.exp %117 : vector<16x1xf32>
    %119 = vector.broadcast %116 : vector<16x1xf32> to vector<16x16xf32>
    %120 = arith.subf %113, %119 : vector<16x16xf32>
    %121 = math.exp %120 : vector<16x16xf32>
    %122 = arith.mulf %118, %81 : vector<16x1xf32>
    %cst_45 = arith.constant dense<0.000000e+00> : vector<16xf32>
    %123 = vector.multi_reduction <add>, %121, %cst_45 [1] : vector<16x16xf32> to vector<16xf32>
    %124 = vector.shape_cast %123 : vector<16xf32> to vector<16x1xf32>
    %125 = arith.addf %122, %124 : vector<16x1xf32>
    %126 = vector.broadcast %118 : vector<16x1xf32> to vector<16x32xf32>
    %127 = arith.mulf %126, %86 : vector<16x32xf32>
    %128 = arith.truncf %121 : vector<16x16xf32> to vector<16x16xbf16>
    %cst_46 = arith.constant dense<0.000000e+00> : vector<16x32xf32>
    %129 = tpu.matmul %128, %112, %cst_46 {dimension_numbers = #tpu.dot_dimension_numbers<[1], [0], [0], [1], [0, 0, 1, 1], [], []>} : vector<16x16xbf16>, vector<16x32xbf16>, vector<16x32xf32> -> vector<16x32xf32>
    %130 = arith.addf %127, %129 : vector<16x32xf32>
    %cst_47 = arith.constant 1.000000e+00 : f32
    %131 = vector.broadcast %cst_47 : f32 to vector<16x1xf32>
    %132 = arith.divf %131, %125 : vector<16x1xf32>
    %133 = vector.broadcast %132 : vector<16x1xf32> to vector<16x32xf32>
    %134 = arith.mulf %130, %133 : vector<16x32xf32>
    %cst_48 = arith.constant 0.000000e+00 : f32
    %135 = vector.broadcast %cst_48 : f32 to vector<16x32xf32>
    %c16 = arith.constant 16 : index
    %c0_49 = arith.constant 0 : index
    %136 = vector.load %arg4[%c16, %c0_49] : memref<32x32xf32, #tpu.memory_space<vmem>>, vector<1x32xf32>
    %c20 = arith.constant 20 : index
    %c0_50 = arith.constant 0 : index
    %137 = vector.load %arg4[%c20, %c0_50] : memref<32x32xf32, #tpu.memory_space<vmem>>, vector<1x1xf32>
    %138 = vector.broadcast %136 : vector<1x32xf32> to vector<16x32xf32>
    %139 = arith.mulf %134, %138 : vector<16x32xf32>
    %cst_51 = arith.constant dense<0.000000e+00> : vector<16xf32>
    %140 = vector.multi_reduction <add>, %139, %cst_51 [1] : vector<16x32xf32> to vector<16xf32>
    %141 = vector.shape_cast %140 : vector<16xf32> to vector<16x1xf32>
    %142 = vector.broadcast %137 : vector<1x1xf32> to vector<16x1xf32>
    %143 = arith.addf %141, %142 : vector<16x1xf32>
    %cst_52 = arith.constant 5.000000e-01 : f32
    %144 = vector.broadcast %cst_52 : f32 to vector<16x1xf32>
    %145 = arith.mulf %144, %143 : vector<16x1xf32>
    %cst_53 = arith.constant 0.707106769 : f32
    %146 = vector.broadcast %cst_53 : f32 to vector<16x1xf32>
    %147 = arith.mulf %143, %146 : vector<16x1xf32>
    %148 = math.erf %147 : vector<16x1xf32>
    %cst_54 = arith.constant 1.000000e+00 : f32
    %149 = vector.broadcast %cst_54 : f32 to vector<16x1xf32>
    %150 = arith.addf %149, %148 : vector<16x1xf32>
    %151 = arith.mulf %145, %150 : vector<16x1xf32>
    %c24 = arith.constant 24 : index
    %c0_55 = arith.constant 0 : index
    %152 = vector.load %arg4[%c24, %c0_55] : memref<32x32xf32, #tpu.memory_space<vmem>>, vector<1x32xf32>
    %153 = vector.broadcast %151 : vector<16x1xf32> to vector<16x32xf32>
    %154 = vector.broadcast %152 : vector<1x32xf32> to vector<16x32xf32>
    %155 = arith.mulf %153, %154 : vector<16x32xf32>
    %156 = arith.addf %135, %155 : vector<16x32xf32>
    %c17 = arith.constant 17 : index
    %c0_56 = arith.constant 0 : index
    %157 = vector.load %arg4[%c17, %c0_56] : memref<32x32xf32, #tpu.memory_space<vmem>>, vector<1x32xf32>
    %c21 = arith.constant 21 : index
    %c0_57 = arith.constant 0 : index
    %158 = vector.load %arg4[%c21, %c0_57] : memref<32x32xf32, #tpu.memory_space<vmem>>, vector<1x1xf32>
    %159 = vector.broadcast %157 : vector<1x32xf32> to vector<16x32xf32>
    %160 = arith.mulf %134, %159 : vector<16x32xf32>
    %cst_58 = arith.constant dense<0.000000e+00> : vector<16xf32>
    %161 = vector.multi_reduction <add>, %160, %cst_58 [1] : vector<16x32xf32> to vector<16xf32>
    %162 = vector.shape_cast %161 : vector<16xf32> to vector<16x1xf32>
    %163 = vector.broadcast %158 : vector<1x1xf32> to vector<16x1xf32>
    %164 = arith.addf %162, %163 : vector<16x1xf32>
    %cst_59 = arith.constant 5.000000e-01 : f32
    %165 = vector.broadcast %cst_59 : f32 to vector<16x1xf32>
    %166 = arith.mulf %165, %164 : vector<16x1xf32>
    %cst_60 = arith.constant 0.707106769 : f32
    %167 = vector.broadcast %cst_60 : f32 to vector<16x1xf32>
    %168 = arith.mulf %164, %167 : vector<16x1xf32>
    %169 = math.erf %168 : vector<16x1xf32>
    %cst_61 = arith.constant 1.000000e+00 : f32
    %170 = vector.broadcast %cst_61 : f32 to vector<16x1xf32>
    %171 = arith.addf %170, %169 : vector<16x1xf32>
    %172 = arith.mulf %166, %171 : vector<16x1xf32>
    %c25 = arith.constant 25 : index
    %c0_62 = arith.constant 0 : index
    %173 = vector.load %arg4[%c25, %c0_62] : memref<32x32xf32, #tpu.memory_space<vmem>>, vector<1x32xf32>
    %174 = vector.broadcast %172 : vector<16x1xf32> to vector<16x32xf32>
    %175 = vector.broadcast %173 : vector<1x32xf32> to vector<16x32xf32>
    %176 = arith.mulf %174, %175 : vector<16x32xf32>
    %177 = arith.addf %156, %176 : vector<16x32xf32>
    %c18 = arith.constant 18 : index
    %c0_63 = arith.constant 0 : index
    %178 = vector.load %arg4[%c18, %c0_63] : memref<32x32xf32, #tpu.memory_space<vmem>>, vector<1x32xf32>
    %c22 = arith.constant 22 : index
    %c0_64 = arith.constant 0 : index
    %179 = vector.load %arg4[%c22, %c0_64] : memref<32x32xf32, #tpu.memory_space<vmem>>, vector<1x1xf32>
    %180 = vector.broadcast %178 : vector<1x32xf32> to vector<16x32xf32>
    %181 = arith.mulf %134, %180 : vector<16x32xf32>
    %cst_65 = arith.constant dense<0.000000e+00> : vector<16xf32>
    %182 = vector.multi_reduction <add>, %181, %cst_65 [1] : vector<16x32xf32> to vector<16xf32>
    %183 = vector.shape_cast %182 : vector<16xf32> to vector<16x1xf32>
    %184 = vector.broadcast %179 : vector<1x1xf32> to vector<16x1xf32>
    %185 = arith.addf %183, %184 : vector<16x1xf32>
    %cst_66 = arith.constant 5.000000e-01 : f32
    %186 = vector.broadcast %cst_66 : f32 to vector<16x1xf32>
    %187 = arith.mulf %186, %185 : vector<16x1xf32>
    %cst_67 = arith.constant 0.707106769 : f32
    %188 = vector.broadcast %cst_67 : f32 to vector<16x1xf32>
    %189 = arith.mulf %185, %188 : vector<16x1xf32>
    %190 = math.erf %189 : vector<16x1xf32>
    %cst_68 = arith.constant 1.000000e+00 : f32
    %191 = vector.broadcast %cst_68 : f32 to vector<16x1xf32>
    %192 = arith.addf %191, %190 : vector<16x1xf32>
    %193 = arith.mulf %187, %192 : vector<16x1xf32>
    %c26 = arith.constant 26 : index
    %c0_69 = arith.constant 0 : index
    %194 = vector.load %arg4[%c26, %c0_69] : memref<32x32xf32, #tpu.memory_space<vmem>>, vector<1x32xf32>
    %195 = vector.broadcast %193 : vector<16x1xf32> to vector<16x32xf32>
    %196 = vector.broadcast %194 : vector<1x32xf32> to vector<16x32xf32>
    %197 = arith.mulf %195, %196 : vector<16x32xf32>
    %198 = arith.addf %177, %197 : vector<16x32xf32>
    %c19 = arith.constant 19 : index
    %c0_70 = arith.constant 0 : index
    %199 = vector.load %arg4[%c19, %c0_70] : memref<32x32xf32, #tpu.memory_space<vmem>>, vector<1x32xf32>
    %c23 = arith.constant 23 : index
    %c0_71 = arith.constant 0 : index
    %200 = vector.load %arg4[%c23, %c0_71] : memref<32x32xf32, #tpu.memory_space<vmem>>, vector<1x1xf32>
    %201 = vector.broadcast %199 : vector<1x32xf32> to vector<16x32xf32>
    %202 = arith.mulf %134, %201 : vector<16x32xf32>
    %cst_72 = arith.constant dense<0.000000e+00> : vector<16xf32>
    %203 = vector.multi_reduction <add>, %202, %cst_72 [1] : vector<16x32xf32> to vector<16xf32>
    %204 = vector.shape_cast %203 : vector<16xf32> to vector<16x1xf32>
    %205 = vector.broadcast %200 : vector<1x1xf32> to vector<16x1xf32>
    %206 = arith.addf %204, %205 : vector<16x1xf32>
    %cst_73 = arith.constant 5.000000e-01 : f32
    %207 = vector.broadcast %cst_73 : f32 to vector<16x1xf32>
    %208 = arith.mulf %207, %206 : vector<16x1xf32>
    %cst_74 = arith.constant 0.707106769 : f32
    %209 = vector.broadcast %cst_74 : f32 to vector<16x1xf32>
    %210 = arith.mulf %206, %209 : vector<16x1xf32>
    %211 = math.erf %210 : vector<16x1xf32>
    %cst_75 = arith.constant 1.000000e+00 : f32
    %212 = vector.broadcast %cst_75 : f32 to vector<16x1xf32>
    %213 = arith.addf %212, %211 : vector<16x1xf32>
    %214 = arith.mulf %208, %213 : vector<16x1xf32>
    %c27 = arith.constant 27 : index
    %c0_76 = arith.constant 0 : index
    %215 = vector.load %arg4[%c27, %c0_76] : memref<32x32xf32, #tpu.memory_space<vmem>>, vector<1x32xf32>
    %216 = vector.broadcast %214 : vector<16x1xf32> to vector<16x32xf32>
    %217 = vector.broadcast %215 : vector<1x32xf32> to vector<16x32xf32>
    %218 = arith.mulf %216, %217 : vector<16x32xf32>
    %219 = arith.addf %198, %218 : vector<16x32xf32>
    %220 = vector.broadcast %8 : vector<1x32xf32> to vector<16x32xf32>
    %221 = arith.addf %219, %220 : vector<16x32xf32>
    %cst_77 = arith.constant dense<0.000000e+00> : vector<16xf32>
    %222 = vector.multi_reduction <add>, %221, %cst_77 [1] : vector<16x32xf32> to vector<16xf32>
    %223 = vector.shape_cast %222 : vector<16xf32> to vector<16x1xf32>
    %cst_78 = arith.constant 3.200000e+01 : f32
    %224 = vector.broadcast %cst_78 : f32 to vector<16x1xf32>
    %225 = arith.divf %223, %224 : vector<16x1xf32>
    %226 = vector.broadcast %225 : vector<16x1xf32> to vector<16x32xf32>
    %227 = arith.subf %221, %226 : vector<16x32xf32>
    %228 = arith.mulf %227, %227 : vector<16x32xf32>
    %cst_79 = arith.constant dense<0.000000e+00> : vector<16xf32>
    %229 = vector.multi_reduction <add>, %228, %cst_79 [1] : vector<16x32xf32> to vector<16xf32>
    %230 = vector.shape_cast %229 : vector<16xf32> to vector<16x1xf32>
    %cst_80 = arith.constant 3.200000e+01 : f32
    %231 = vector.broadcast %cst_80 : f32 to vector<16x1xf32>
    %232 = arith.divf %230, %231 : vector<16x1xf32>
    %233 = vector.broadcast %225 : vector<16x1xf32> to vector<16x32xf32>
    %234 = arith.subf %221, %233 : vector<16x32xf32>
    %cst_81 = arith.constant 9.99999974E-6 : f32
    %235 = vector.broadcast %cst_81 : f32 to vector<16x1xf32>
    %236 = arith.addf %232, %235 : vector<16x1xf32>
    %237 = math.rsqrt %236 : vector<16x1xf32>
    %238 = vector.broadcast %237 : vector<16x1xf32> to vector<16x32xf32>
    %239 = arith.mulf %234, %238 : vector<16x32xf32>
    %240 = vector.broadcast %4 : vector<1x32xf32> to vector<16x32xf32>
    %241 = arith.mulf %239, %240 : vector<16x32xf32>
    %242 = vector.broadcast %5 : vector<1x32xf32> to vector<16x32xf32>
    %243 = arith.addf %241, %242 : vector<16x32xf32>
    %244 = arith.truncf %243 : vector<16x32xf32> to vector<16x32xbf16>
    %cst_82 = arith.constant 0.176776692 : f32
    %245 = vector.broadcast %cst_82 : f32 to vector<16x32xf32>
    %246 = arith.mulf %243, %245 : vector<16x32xf32>
    %247 = arith.truncf %246 : vector<16x32xf32> to vector<16x32xbf16>
    %cst_83 = arith.constant dense<0.000000e+00> : vector<16x16xf32>
    %248 = tpu.matmul %247, %244, %cst_83 {dimension_numbers = #tpu.dot_dimension_numbers<[1], [1], [0], [0], [0, 0, 1, 0], [], []>} : vector<16x32xbf16>, vector<16x32xbf16>, vector<16x16xf32> -> vector<16x16xf32>
    %cst_84 = arith.constant dense<0xFF800000> : vector<16xf32>
    %249 = vector.multi_reduction <maximumf>, %248, %cst_84 [1] : vector<16x16xf32> to vector<16xf32>
    %250 = vector.shape_cast %249 : vector<16xf32> to vector<16x1xf32>
    %251 = vector.broadcast %250 : vector<16x1xf32> to vector<16x16xf32>
    %252 = arith.subf %248, %251 : vector<16x16xf32>
    %253 = math.exp %252 : vector<16x16xf32>
    %254 = arith.truncf %253 : vector<16x16xf32> to vector<16x16xbf16>
    %cst_85 = arith.constant dense<0.000000e+00> : vector<16x32xf32>
    %255 = tpu.matmul %254, %244, %cst_85 {dimension_numbers = #tpu.dot_dimension_numbers<[1], [0], [0], [1], [0, 0, 1, 1], [], []>} : vector<16x16xbf16>, vector<16x32xbf16>, vector<16x32xf32> -> vector<16x32xf32>
    %cst_86 = arith.constant dense<0.000000e+00> : vector<16xf32>
    %256 = vector.multi_reduction <add>, %253, %cst_86 [1] : vector<16x16xf32> to vector<16xf32>
    %257 = vector.shape_cast %256 : vector<16xf32> to vector<16x1xf32>
    %cst_87 = arith.constant 1.000000e+00 : f32
    %258 = vector.broadcast %cst_87 : f32 to vector<16x1xf32>
    %259 = arith.divf %258, %257 : vector<16x1xf32>
    %260 = vector.broadcast %259 : vector<16x1xf32> to vector<16x32xf32>
    %261 = arith.mulf %255, %260 : vector<16x32xf32>
    %262 = vector.broadcast %6 : vector<1x32xf32> to vector<16x32xf32>
    %263 = arith.mulf %262, %261 : vector<16x32xf32>
    %264 = arith.addf %221, %263 : vector<16x32xf32>
    %265 = vector.broadcast %7 : vector<1x32xf32> to vector<16x32xf32>
    %266 = arith.mulf %265, %264 : vector<16x32xf32>
    %267 = arith.addf %36, %266 : vector<16x32xf32>
    %c0_88 = arith.constant 0 : index
    %c0_89 = arith.constant 0 : index
    %c0_90 = arith.constant 0 : index
    %268 = vector.load %arg6[%c0_88, %c0_89, %c0_90] : memref<1x16x32xf32, #tpu.memory_space<vmem>>, vector<1x16x32xf32>
    %269 = vector.shape_cast %268 : vector<1x16x32xf32> to vector<16x32xf32>
    %270 = vector.shape_cast %267 : vector<16x32xf32> to vector<1x16x32xf32>
    tpu.vector_store %arg6[%c0_88, %c0_89, %c0_90], %270 {strides = array<i32>} : memref<1x16x32xf32, #tpu.memory_space<vmem>>, vector<1x16x32xf32>,
    %271 = arith.truncf %267 : vector<16x32xf32> to vector<16x32xbf16>
    %c0_91 = arith.constant 0 : index
    %c0_92 = arith.constant 0 : index
    %272 = vector.load %arg5[%c0_91, %c0_92] : memref<16x32xbf16, #tpu.memory_space<vmem>>, vector<16x32xbf16>
    %cst_93 = arith.constant dense<0.000000e+00> : vector<16x16xf32>
    %273 = tpu.matmul %271, %272, %cst_93 {dimension_numbers = #tpu.dot_dimension_numbers<[1], [1], [0], [0], [0, 0, 1, 0], [], []>} : vector<16x32xbf16>, vector<16x32xbf16>, vector<16x16xf32> -> vector<16x16xf32>
    %274 = vector.broadcast %9 : vector<1x16xf32> to vector<16x16xf32>
    %275 = arith.addf %273, %274 : vector<16x16xf32>
    %276 = arith.mulf %275, %275 : vector<16x16xf32>
    %cst_94 = arith.constant dense<0.000000e+00> : vector<16xf32>
    %277 = vector.multi_reduction <add>, %276, %cst_94 [1] : vector<16x16xf32> to vector<16xf32>
    %278 = vector.shape_cast %277 : vector<16xf32> to vector<16x1xf32>
    %279 = math.rsqrt %278 : vector<16x1xf32>
    %280 = vector.broadcast %279 : vector<16x1xf32> to vector<16x16xf32>
    %281 = arith.mulf %275, %280 : vector<16x16xf32>
    %c0_95 = arith.constant 0 : index
    %c0_96 = arith.constant 0 : index
    %c0_97 = arith.constant 0 : index
    %282 = vector.load %arg7[%c0_95, %c0_96, %c0_97] : memref<1x16x16xf32, #tpu.memory_space<vmem>>, vector<1x16x16xf32>
    %283 = vector.shape_cast %282 : vector<1x16x16xf32> to vector<16x16xf32>
    %284 = vector.shape_cast %281 : vector<16x16xf32> to vector<1x16x16xf32>
    tpu.vector_store %arg7[%c0_95, %c0_96, %c0_97], %284 {strides = array<i32>} : memref<1x16x16xf32, #tpu.memory_space<vmem>>, vector<1x16x16xf32>,
    %cst_98 = arith.constant dense<0.000000e+00> : vector<16xf32>
    %285 = vector.multi_reduction <add>, %281, %cst_98 [0] : vector<16x16xf32> to vector<16xf32>
    %286 = vector.shape_cast %285 : vector<16xf32> to vector<1x16xf32>
    %cst_99 = arith.constant 1.600000e+01 : f32
    %287 = vector.broadcast %cst_99 : f32 to vector<1x16xf32>
    %288 = arith.divf %286, %287 : vector<1x16xf32>
    %289 = arith.mulf %288, %10 : vector<1x16xf32>
    %cst_100 = arith.constant dense<0.000000e+00> : vector<1xf32>
    %290 = vector.multi_reduction <add>, %289, %cst_100 [1] : vector<1x16xf32> to vector<1xf32>
    %291 = vector.shape_cast %290 : vector<1xf32> to vector<1x1xf32>
    %292 = arith.addf %291, %11 : vector<1x1xf32>
    %cst_101 = arith.constant 0.000000e+00 : f32
    %293 = vector.broadcast %cst_101 : f32 to vector<8x128xf32>
    %294 = vector.broadcast %292 : vector<1x1xf32> to vector<8x128xf32>
    %295 = arith.addf %294, %293 : vector<8x128xf32>
    %c0_102 = arith.constant 0 : index
    %c0_103 = arith.constant 0 : index
    %c0_104 = arith.constant 0 : index
    %296 = vector.load %arg8[%c0_102, %c0_103, %c0_104] : memref<1x8x128xf32, #tpu.memory_space<vmem>>, vector<1x8x128xf32>
    %297 = vector.shape_cast %296 : vector<1x8x128xf32> to vector<8x128xf32>
    %298 = vector.shape_cast %295 : vector<8x128xf32> to vector<1x8x128xf32>
    tpu.vector_store %arg8[%c0_102, %c0_103, %c0_104], %298 {strides = array<i32>} : memref<1x8x128xf32, #tpu.memory_space<vmem>>, vector<1x8x128xf32>,
    return
  }
  func.func @transform_0(%arg0: i32) -> (i32, i32, i32) {
    %c0_i32 = arith.constant 0 : i32
    %c0_i32_0 = arith.constant 0 : i32
    %c0_i32_1 = arith.constant 0 : i32
    return %arg0, %c0_i32, %c0_i32_0 : i32, i32, i32
  }
  func.func @transform_1(%arg0: i32) -> (i32, i32, i32) {
    %c0_i32 = arith.constant 0 : i32
    %c0_i32_0 = arith.constant 0 : i32
    %c0_i32_1 = arith.constant 0 : i32
    return %arg0, %c0_i32, %c0_i32_0 : i32, i32, i32
  }
  func.func @transform_2(%arg0: i32) -> (i32, i32, i32) {
    %c0_i32 = arith.constant 0 : i32
    %c0_i32_0 = arith.constant 0 : i32
    %c0_i32_1 = arith.constant 0 : i32
    return %arg0, %c0_i32, %c0_i32_0 : i32, i32, i32
  }
  func.func @transform_3(%arg0: i32) -> (i32, i32) {
    %c0_i32 = arith.constant 0 : i32
    %c0_i32_0 = arith.constant 0 : i32
    %c0_i32_1 = arith.constant 0 : i32
    return %c0_i32, %c0_i32_0 : i32, i32
  }
  func.func @transform_4(%arg0: i32) -> (i32, i32) {
    %c0_i32 = arith.constant 0 : i32
    %c0_i32_0 = arith.constant 0 : i32
    %c0_i32_1 = arith.constant 0 : i32
    return %c0_i32, %c0_i32_0 : i32, i32
  }
  func.func @transform_5(%arg0: i32) -> (i32, i32, i32) {
    %c0_i32 = arith.constant 0 : i32
    %c0_i32_0 = arith.constant 0 : i32
    %c0_i32_1 = arith.constant 0 : i32
    return %arg0, %c0_i32, %c0_i32_0 : i32, i32, i32
  }
  func.func @transform_6(%arg0: i32) -> (i32, i32, i32) {
    %c0_i32 = arith.constant 0 : i32
    %c0_i32_0 = arith.constant 0 : i32
    %c0_i32_1 = arith.constant 0 : i32
    return %arg0, %c0_i32, %c0_i32_0 : i32, i32, i32
  }
  func.func @transform_7(%arg0: i32) -> (i32, i32, i32) {
    %c0_i32 = arith.constant 0 : i32
    %c0_i32_0 = arith.constant 0 : i32
    %c0_i32_1 = arith.constant 0 : i32
    return %arg0, %c0_i32, %c0_i32_0 : i32, i32, i32
  }
}

</mosaic_0001>

<bundles_post_ra>
// kernel: tpu_custom_call.1
= control target key start
LH: loop header
LB: loop body
LE: loop exit
PB: predicated region body
PF: predicated region fallthrough
CT: control target
= control target key end

     0   :  { %s2607_s0 = inlined_call_operand.hbm [shape: bf16[2,16,32], index: 0, kind: input, shape index: {}]   ;;  %s2608_s1 = inlined_call_operand.hbm [shape: bf16[2,16,32], index: 1, kind: input, shape index: {}]   ;;  %s2609_s2 = inlined_call_operand.hbm [shape: bf16[2,16,32], index: 2, kind: input, shape index: {}]   ;;  %s2610_s3 = inlined_call_operand.hbm [shape: f32[32,32], index: 3, kind: input, shape index: {}]   ;;  %s2611_s4 = inlined_call_operand.vmem [shape: bf16[16,32], index: 4, kind: input, shape index: {}]   ;;  %s2612_s5 = inlined_call_operand.hbm [shape: f32[2,16,32], index: 5, kind: output, shape index: {0}]   ;;  %s2613_s6 = inlined_call_operand.hbm [shape: f32[2,16,16], index: 6, kind: output, shape index: {1}]   ;;  %s2614_s7 = inlined_call_operand.hbm [shape: f32[2,8,128], index: 7, kind: output, shape index: {2}]  }
   0x1   :  { %2639 = sst [smem:[#allocation24_spill]] %s2608_s1 }
   0x2   :  { %2640 = sst [smem:[#allocation25_spill]] %s2612_s5 }
   0x3   :  { %2641 = sst [smem:[#allocation26_spill]] %s2613_s6 }
   0x4   :  { %2642 = sst [smem:[#allocation27_spill]] %s2614_s7 }
   0x5   :  { %13 = vsyncpa [#allocation3], 0 }
   0x6   :  { %15 = vsyncpa [#allocation3 + $0x1], 0 }
   0x7   :  { %16 = vsyncpa [#allocation6], 0 }
   0x8   :  { %18 = vsyncpa [#allocation6 + $0x1], 0 }
   0x9   :  { %19 = vsyncpa [#allocation9], 0 }
   0xa   :  { %20 = vsyncpa [#allocation4], 0 }
   0xb   :  { %22 = vsyncpa [#allocation4 + $0x1], 0 }
   0xc   :  { %23 = vsyncpa [#allocation12], 0 }
   0xd   :  { %25 = vsyncpa [#allocation12 + $0x1], 0  ;;  %s2112_s24 = smov 0   ;;  %s2114_s25 = smov 0  }
   0xe   :  { %s2116_s26 = smov 0   ;;  %s2118_s27 = smov 0  }
   0xf LB: > { %2643 = sst [smem:[#allocation19_spill]] %s2042_s24  ;;  %s2133_s28 = sadd.s32 1, %s2054_s27   ;;  %s2054_s27 = sphi %s2118_s27, %s2676_s27   ;;  %s2050_s26 = sphi %s2116_s26, %s2680_s26   ;;  %s2046_s25 = sphi %s2114_s25, %s2679_s25   ;;  %s2042_s24 = sphi %s2112_s24, %s2678_s24  }
  0x10   : > { %2644 = sst [smem:[#allocation20_spill]] %s2054_s27  ;;  %s38_s29 = sadd.s32 1, %s2050_s26 }
  0x11   : > { %2645 = sst [smem:[#allocation21_spill]] %s2133_s28  ;;  %s35_s30 = ssub.s32 %s2054_s27, %s2133_s28 }
  0x12   : > { %p2615_p0 = scmp.ne.s32.totalorder %s2050_s26, %s2046_s25  ;;  %p36_p1 = scmp.eq.s32.totalorder %s35_s30, 0 }
  0x13   : > { %p46_p2 = scmp.eq.s32.totalorder %s2054_s27, 0  ;;  %p1690_p4 = scmp.lt.s32.totalorder %s2054_s27, 2 }
  0x14   : > { %s2144_s8 = scalar_select %p36_p1, %s2050_s26, %s38_s29  }
  0x15   : > { %p47_p5 = por %p46_p2, %p2615_p0  ;;  %s2621_s9 = sand.u32 1, %s2050_s26  }
  0x16   : > { %2646 = sst [smem:[#allocation22_spill]] %s2144_s8  ;;  %s2152_s10 = sshll.u32 %s2621_s9, 3 }
  0x17   : > { %s2155_s11 = sshll.u32 %s2054_s27, 7  ;;  %p2157_p6 = pnand %p1690_p4, %p47_p5 }
  0x18   : > { %s284_s13 = sand.u32 1, %s2054_s27   ;;  %s2648_s1 = sld [smem:[#allocation24_spill]] }
  0x19   : > { %s2647_s12 = scalar_select %p2157_p6, 1, 0 }
  0x1a   : > { %s288_s17 = scalar_lea.vmem [#allocation5], %s2152_s10  ;;  %s2171_s19 = scalar_lea.sflag [#allocation6], %s284_s13 }
  0x1b   : > { %s295_s18 = sshll.u32 %s288_s17, 4  ;;  %p2177_p8 = pneg %p2157_p6  ;;  %s2169_s18 = int_to_ptr.vmem [resolvable:$true] %s295_s18 }
  0x1d   : > { %s2649_s21 = scalar_select %p2177_p8, 1, 0 }
  0x1e   : > { %s2166_s16 = scalar_lea.hbm %s2648_s1, %s2155_s11  ;;  %s1807_s29 = scalar_lea.hbm %s2648_s1, 256 }
  0x1f   : > { %s1802_s20 = scalar_lea.hbm %s2166_s16, 128  ;;  %p1808_p11 = scmp.lt.u32.totalorder %s2166_s16, %s2648_s1 }
  0x20   : > { %p1803_p7 = scmp.ne.s32.totalorder %s2166_s16, %s1802_s20  ;;  %p1809_p12 = scmp.lt.u32.totalorder %s1807_s29, %s1802_s20 }
  0x21   : > { %p1811_p1 = scmp.lt.u32.totalorder %s1802_s20, %s2166_s16 }
  0x22   : > { %p1805_p9 = pnand %p2177_p8, %p1803_p7  ;;  %p1810_p13 = por %p1809_p12, %p1808_p11 }
  0x24   : > { %p1806_p10 = pneg %p1805_p9  ;;  %p1812_p2 = por %p1811_p1, %p1810_p13 }
  0x26   : > { %p1813_p4 = pnand %p1812_p2, %p1806_p10 }
  0x28   : > { %1816 = shalt.err (!%p1813_p4)
}
  0x29   : > { %s1817_s13 = scalar_lea.vmem %s2169_s18, 128  ;;  %s2056_s15 = smov [#allocation5]  }
  0x2a   : > { %p1818_p5 = scmp.ne.s32.totalorder %s2169_s18, %s1817_s13  ;;  %s1822_s17 = sshll.u32 %s2056_s15, 4  ;;  %s1823_s17 = int_to_ptr.vmem [resolvable:$false] %s1822_s17 }
  0x2b   : > { %s1824_s22 = scalar_lea.vmem %s1823_s17, 256  ;;  %p1825_p3 = scmp.lt.s32.totalorder %s2169_s18, %s1823_s17 }
  0x2c   : > { %p1820_p7 = pnand %p1818_p5, %p2177_p8  ;;  %p1826_p0 = scmp.lt.s32.totalorder %s1824_s22, %s1817_s13 }
  0x2e   : > { %p1821_p9 = pneg %p1820_p7  ;;  %p1827_p11 = por %p1826_p0, %p1825_p3 }
  0x30   : > { %p1828_p12 = pnand %p1827_p11, %p1821_p9 }
  0x32   : > { %1831 = shalt.err (!%p1828_p12)
}
  0x33   : > { %s2617_s20 = smov 64   ;;  %s2619_s23 = smov 4  }
  0x34   : > { %1675 = dma.hbm_to_vmem [thread:$0]  (!%p2157_p6), %s2166_s16, 128, %s2169_s18, %s2171_s19, %s2617_s20, %s2617_s20, %s2619_s23  }
  0x35   : > { %s2205_s29 = sadd.s32 4294967295, %s2054_s27   ;;  %s2616_s30 = sadd.s32 4294967294, %s2054_s27  }
  0x36   : > { %p51_p0 = scmp.ne.s32.totalorder %s2046_s25, %s2042_s24  ;;  %p2629_p3 = scmp.eq.s32.totalorder %s2205_s29, 0 }
  0x37   : > { %p169_p10 = scmp.eq.s32.totalorder %s2205_s29, 1  ;;  %p175_p13 = scmp.eq.s32.totalorder %s2616_s30, 1 }
  0x38   : > { %p2216_p1 = por %p2629_p3, %p51_p0  ;;  %p1514_p2 = scmp.ge.s32.totalorder %s2054_s27, 1 }
  0x39   : > { %p2651_p4 = scmp.ne.s32.totalorder %s2050_s26, %s2046_s25  ;;  %p2228_p7 = por %p175_p13, %p51_p0 }
  0x3a   : > { %s2650_s14 = scalar_select %p2216_p1, 1, 0 }
  0x3b   : > { %p2224_p5 = por %p169_p10, %p2651_p4  ;;  %p234_p9 = scmp.lt.s32.totalorder %s2054_s27, 3 }
  0x3c   : > { %s2653_s18 = scalar_select %p2228_p7, 1, 0 }
  0x3d   : > { %s2652_s16 = scalar_select %p2224_p5, 1, 0 }
  0x3e   : > { %2654 = sst [smem:[#allocation23_spill]] %s2653_s18  ;;  %p2233_p11 = pnand %p1514_p2, %p234_p9 }
  0x3f   : > { %s2059_s15 = smov [#allocation8]   ;;  %s2245_s20 = scalar_lea.hbm %s2607_s0, %s2155_s11 }
  0x40   : > { %s2655_s13 = scalar_select %p2233_p11, 1, 0 }
  0x41   : > { %s246_s17 = sshll.u32 %s2059_s15, 4  ;;  %p1665_p12 = pneg %p2233_p11  ;;  %s2237_s17 = int_to_ptr.vmem [resolvable:$true] %s246_s17 }
  0x42   : > { %s267_s9 = scalar_lea.vmem [#allocation2], %s2152_s10  ;;  %s2260_s28 = scalar_lea.hbm %s2609_s2, %s2155_s11 }
  0x43   : > { %p2249_p0 = pnand %p1665_p12, %p2629_p3  ;;  %s274_s1 = sshll.u32 %s267_s9, 4  ;;  %s2254_s1 = int_to_ptr.vmem [resolvable:$true] %s274_s1 }
  0x44   : > { %s1832_s30 = scalar_lea.hbm %s2610_s3, 512 }
  0x45   : > { %p1833_p10 = scmp.ne.s32.totalorder %s2610_s3, %s1832_s30  ;;  %p1834_p13 = pneg %p2249_p0 }
  0x46   : > { %p1839_p9 = scmp.lt.u32.totalorder %s1832_s30, %s2610_s3 }
  0x47   : > { %p1835_p2 = pnand %p1834_p13, %p1833_p10 }
  0x49   : > { %p1836_p4 = pneg %p1835_p2 }
  0x4b   : > { %p1841_p12 = pnand %p1839_p9, %p1836_p4 }
  0x4d   : > { %1844 = shalt.err (!%p1841_p12)
}
  0x4e   : > { %s1845_s8 = scalar_lea.vmem %s2237_s17, 512  ;;  %p1853_p1 = scmp.lt.s32.totalorder %s2237_s17, %s2237_s17 }
  0x4f   : > { %p1846_p3 = scmp.ne.s32.totalorder %s2237_s17, %s1845_s8  ;;  %p1854_p11 = scmp.lt.s32.totalorder %s1845_s8, %s1845_s8 }
  0x51   : > { %p1848_p7 = pnand %p1846_p3, %p1834_p13  ;;  %p1855_p6 = por %p1854_p11, %p1853_p1 }
  0x53   : > { %p1849_p5 = pneg %p1848_p7 }
  0x55   : > { %p1856_p8 = pnand %p1855_p6, %p1849_p5 }
  0x57   : > { %1859 = shalt.err (!%p1856_p8)
}
  0x58   : > { %s2060_s24 = smov 128   ;;  %s2061_s7 = smov 8  }
  0x59   : > { %1668 = dma.hbm_to_vmem [thread:$0]  (!%p2249_p0), %s2610_s3, 512, %s2237_s17, [#allocation9], %s2060_s24, %s2060_s24, %s2061_s7  }
  0x5a   : > { %s2657_s18 = sand.u32 1, %s2050_s26   ;;  %s1860_s30 = scalar_lea.hbm %s2245_s20, 128 }
  0x5b   : > { %s2285_s15 = scalar_lea.sflag [#allocation3], %s2657_s18  ;;  %p1861_p6 = scmp.ne.s32.totalorder %s2245_s20, %s1860_s30 }
  0x5c   : > { %p2658_p8 = scmp.ne.s32.totalorder %s2649_s21, 0  ;;  %s1865_s8 = scalar_lea.hbm %s2607_s0, 256 }
  0x5d   : > { %p1866_p5 = scmp.lt.u32.totalorder %s2245_s20, %s2607_s0  ;;  %p1867_p7 = scmp.lt.u32.totalorder %s1865_s8, %s1860_s30 }
  0x5e   : > { %p1863_p3 = pnand %p1861_p6, %p2658_p8  ;;  %p1869_p10 = scmp.lt.u32.totalorder %s1860_s30, %s2245_s20 }
  0x5f   : > { %p1868_p11 = por %p1867_p7, %p1866_p5 }
  0x60   : > { %p1864_p1 = pneg %p1863_p3 }
  0x61   : > { %p1870_p0 = por %p1869_p10, %p1868_p11 }
  0x63   : > { %p1871_p13 = pnand %p1870_p0, %p1864_p1 }
  0x65   : > { %1874 = shalt.err (!%p1871_p13)
}
  0x66   : > { %s1875_s23 = scalar_lea.vmem %s2254_s1, 128  ;;  %s2062_s17 = smov [#allocation2]  }
  0x67   : > { %p1876_p2 = scmp.ne.s32.totalorder %s2254_s1, %s1875_s23  ;;  %s1880_s24 = sshll.u32 %s2062_s17, 4  ;;  %s1881_s24 = int_to_ptr.vmem [resolvable:$false] %s1880_s24 }
  0x68   : > { %s1882_s5 = scalar_lea.vmem %s1881_s24, 256  ;;  %p1883_p12 = scmp.lt.s32.totalorder %s2254_s1, %s1881_s24 }
  0x69   : > { %p1878_p4 = pnand %p1876_p2, %p2658_p8  ;;  %p1884_p6 = scmp.lt.s32.totalorder %s1882_s5, %s1875_s23 }
  0x6b   : > { %p1879_p9 = pneg %p1878_p4  ;;  %p1885_p3 = por %p1884_p6, %p1883_p12 }
  0x6d   : > { %p1886_p5 = pnand %p1885_p3, %p1879_p9 }
  0x6f   : > { %1889 = shalt.err (!%p1886_p5)
}
  0x70   : > { %p2659_p1 = scmp.ne.s32.totalorder %s2647_s12, 0  ;;  %s2660_s6 = smov 4  }
  0x71   : > { %s2661_s7 = smov 64   ;;  %s309_s27 = scalar_lea.vmem [#allocation7], %s2152_s10 }
  0x72   : > { %1672 = dma.hbm_to_vmem [thread:$0]  (!%p2659_p1), %s2245_s20, 128, %s2254_s1, %s2285_s15, %s2661_s7, %s2661_s7, %s2660_s6  }
  0x73   : > { %s316_s11 = sshll.u32 %s309_s27, 4  ;;  %s1890_s18 = scalar_lea.hbm %s2260_s28, 128  ;;  %s2313_s11 = int_to_ptr.vmem [resolvable:$true] %s316_s11 }
  0x74   : > { %p1891_p7 = scmp.ne.s32.totalorder %s2260_s28, %s1890_s18  ;;  %s1895_s9 = scalar_lea.hbm %s2609_s2, 256 }
  0x75   : > { %p1896_p0 = scmp.lt.u32.totalorder %s2260_s28, %s2609_s2  ;;  %p1897_p13 = scmp.lt.u32.totalorder %s1895_s9, %s1890_s18 }
  0x76   : > { %p1893_p11 = pnand %p1891_p7, %p2658_p8  ;;  %p1899_p4 = scmp.lt.u32.totalorder %s1890_s18, %s2260_s28 }
  0x77   : > { %p1898_p2 = por %p1897_p13, %p1896_p0 }
  0x78   : > { %p1894_p10 = pneg %p1893_p11 }
  0x79   : > { %p1900_p9 = por %p1899_p4, %p1898_p2 }
  0x7b   : > { %p1901_p12 = pnand %p1900_p9, %p1894_p10 }
  0x7d   : > { %1904 = shalt.err (!%p1901_p12)
}
  0x7e   : > { %s1905_s1 = scalar_lea.vmem %s2313_s11, 128  ;;  %s2063_s10 = smov [#allocation7]  }
  0x7f   : > { %p1906_p6 = scmp.ne.s32.totalorder %s2313_s11, %s1905_s1  ;;  %s1910_s20 = sshll.u32 %s2063_s10, 4  ;;  %s1911_s20 = int_to_ptr.vmem [resolvable:$false] %s1910_s20 }
  0x80   : > { %s1912_s15 = scalar_lea.vmem %s1911_s20, 256  ;;  %p1913_p7 = scmp.lt.s32.totalorder %s2313_s11, %s1911_s20 }
  0x81   : > { %p1908_p3 = pnand %p1906_p6, %p2658_p8  ;;  %p1914_p11 = scmp.lt.s32.totalorder %s1912_s15, %s1905_s1 }
  0x83   : > { %p1909_p5 = pneg %p1908_p3  ;;  %p1915_p0 = por %p1914_p11, %p1913_p7 }
  0x85   : > { %p1916_p13 = pnand %p1915_p0, %p1909_p5 }
  0x87   : > { %1919 = shalt.err (!%p1916_p13)
}
  0x88   : > { %1678 = dma.hbm_to_vmem [thread:$0]  (!%p2659_p1), %s2260_s28, 128, %s2313_s11, %s2171_s19, %s2661_s7, %s2661_s7, %s2660_s6  }
  0x89   : > { %p2662_p8 = scmp.ne.s32.totalorder %s2655_s13, 0 }
  0x8a   : > { %s2343_s21 = sand.u32 (!%p2662_p8), 1, %s2046_s25   ;;  %p2663_p10 = scmp.ne.s32.totalorder (!%p2662_p8), %s2650_s14, 0 }
  0x8b   : > { %328 = sbr.rel (%p2662_p8) target bundleno = 3313 (0xcf1), region = 40  ;;  %s2346_s17 = sshll.u32 (!%p2662_p8), %s2343_s21, 3 }
  0x8c   : > { %s331_s12 = scalar_lea.sflag (!%p2662_p8), [#allocation3], %s2343_s21  ;;  %s334_s24 = scalar_lea.vmem (!%p2662_p8), [#allocation2], %s2346_s17 }
  0x92   : > { %2021 = dma.done.wait (%p2663_p10), %s331_s12, 128  }
  0x93   : > { %2023 = vsyncadd (%p2663_p10), %s331_s12, 4294967168  ;;  %s339_s28 = sand.u32 1, %s2205_s29   ;;  %s343_s13 = scalar_lea.vmem [#allocation5], %s2346_s17 }
  0x94   : > { %s340_s19 = scalar_lea.sflag [#allocation6], %s339_s28 }
  0x95   : > { %2025 = dma.done.wait (%p2663_p10), %s340_s19, 256  }
  0x96   : > { %2027 = vsyncadd (%p2663_p10), %s340_s19, 4294967040  ;;  %s352_s5 = scalar_lea.vmem [#allocation7], %s2346_s17  ;;  %p2664_p1 = scmp.eq.s32.totalorder %s2205_s29, 0 }
  0x98   : > { %2029 = dma.done.wait (%p2664_p1), [#allocation9], 512   ;;  %p2665_p2 = pmov %p2664_p1 }
  0x99   : > { %vm424_vm0 = vcmask 261120   ;;  %v1584_v0 = vld [vmem:[%s334_s24] sm:$0xff]   ;;  %v1588_v22 = vld [vmem:[%s343_s13] sm:$0xff]   ;;  %v2064_v35 = vmov 0.0   ;;  %vm2065_vm1 = vmmov 0   ;;  %vm557_vm2 = vcmask 130048  }
  0x9a   : > { %2031 = vsyncadd (%p2665_p2), [#allocation9], 4294966784  ;;  %v1580_v1 = vld [vmem:[%s352_s5] sm:$0xff]   ;;  %v1585_v2 = vunpack.c.l.bf16 %v1584_v0  ;;  %v1586_v3 = vunpack.c.h.bf16 %v1584_v0  ;;  %v1589_v29 = vunpack.c.l.bf16 %v1588_v22  ;;  %v1590_v33 = vunpack.c.h.bf16 %v1588_v22  ;;  %1611 = vmatprep.subr.bf16.mxu1 %v2064_v35  ;;  %1605 = vmatprep.subr.bf16.mxu0 %v2064_v35  ;;  %v1536_v59 = vld [vmem:[#allocation8] ss:$0 sm:$0xff]  ;;  %s1531_s7 = sshll.u32 %s2343_s21, 4 }
  0x9b   : > { %v1581_v4 = vunpack.c.l.bf16 %v1580_v1  ;;  %v1582_v5 = vunpack.c.h.bf16 %v1580_v1  ;;  %1607 = vmatprep.mubr.msk.bf16.mxu0 %vm2065_vm1, %v2064_v35  ;;  %1613 = vmatprep.mubr.msk.bf16.mxu1 %vm2065_vm1, %v2064_v35  ;;  %s2465_s27 = scalar_lea.vmem [#allocation10], %s1531_s7  ;;  %s399_s11 = scalar_lea.vmem [#allocation11], %s1531_s7  ;;  %vm1262_vm3 = vcmask 122880  }
  0x9c   : > { %v471_v6 = vsel %vm424_vm0, %v1585_v2, 0.0  ;;  %v474_v8 = vsel %vm424_vm0, %v1586_v3, 0.0  ;;  %v639_v32 = vsel %vm424_vm0, %v1589_v29, 0.0  ;;  %v642_v34 = vsel %vm424_vm0, %v1590_v33, 0.0  ;;  %s1577_s18 = sshll.u32 %s2205_s29, 8  ;;  %s1313_s30 = sshll.u32 %s399_s11, 4  ;;  %s2488_s30 = int_to_ptr.vmem [resolvable:$true] %s1313_s30 }
  0x9d   : > { %v425_v7 = vsel %vm424_vm0, %v1581_v4, 0.0  ;;  %472 = vadd.xlane.f32.xlu0 %v471_v6  ;;  %v428_v9 = vsel %vm424_vm0, %v1582_v5, 0.0  ;;  %s2666_s8 = sld [smem:[#allocation26_spill]]  ;;  %s2492_s1 = scalar_lea.sflag [#allocation12], %s339_s28 }
  0x9e   : > { %426 = vadd.xlane.f32.xlu1 %v425_v7  ;;  %s1920_s10 = scalar_lea.vmem %s2488_s30, 256  ;;  %p2667_p9 = scmp.ne.s32.totalorder %s2652_s16, 0 }
  0x9f   : > { %p1921_p4 = scmp.ne.s32.totalorder %s2488_s30, %s1920_s10  ;;  %s2067_s20 = smov [#allocation11]  }
  0xa0   : > { %s1924_s15 = sshll.u32 %s2067_s20, 4  ;;  %s1925_s15 = int_to_ptr.vmem [resolvable:$false] %s1924_s15 }
  0xa1   : > { %475 = vadd.xlane.f32.xlu0 %v474_v8  ;;  %p1922_p12 = pnand %p1921_p4, %p2667_p9  ;;  %s1926_s12 = scalar_lea.vmem %s1925_s15, 512 }
  0xa2   : > { %429 = vadd.xlane.f32.xlu1 %v428_v9  ;;  %p1927_p3 = scmp.lt.s32.totalorder %s2488_s30, %s1925_s15  ;;  %p1928_p5 = scmp.lt.s32.totalorder %s1926_s12, %s1920_s10 }
  0xa3   : > { %s2486_s23 = scalar_lea.hbm %s2666_s8, %s1577_s18  ;;  %p1923_p6 = pneg %p1922_p12 }
  0xa4   : > { %p1929_p7 = por %p1928_p5, %p1927_p3 }
  0xa6   : > { %p1930_p11 = pnand %p1929_p7, %p1923_p6 }
 0x12a   : > { %v473_v10 = vpop.xlane.xlu0 %472 }
 0x12b   : > { %v427_v11 = vpop.xlane.xlu1 %426  ;;  %v477_v12 = vmul.f32 0.03125, %v473_v10  ;;  %v1535_v10 = vld [vmem:[#allocation8 + $0x3] ss:$0 sm:$0xff] }
 0x12c   : > { %v432_v13 = vmul.f32 0.03125, %v427_v11 }
 0x12d   : > { %v479_v14 = vsub.f32 %v1585_v2, %v477_v12  ;;  %v1537_v2 = vld [vmem:[#allocation8 + $0x1] ss:$0 sm:$0xff] }
 0x12e   : > { %v2371_v15 = vsub.f32 %v1581_v4, %v432_v13  ;;  %v476_v16 = vpop.xlane.xlu0 %475 }
 0x12f   : > { %v430_v17 = vpop.xlane.xlu1 %429  ;;  %v478_v18 = vmul.f32 0.03125, %v476_v16  ;;  %v481_v19 = vmul.f32 %v479_v14, %v479_v14 }
 0x130   : > { %v433_v20 = vmul.f32 0.03125, %v430_v17  ;;  %v436_v21 = vmul.f32 %v2371_v15, %v2371_v15 }
 0x131   : > { %v480_v23 = vsub.f32 %v1586_v3, %v478_v18  ;;  %v483_v24 = vsel %vm424_vm0, %v481_v19, 0.0  ;;  %v1534_v3 = vld [vmem:[#allocation8 + $0x2] ss:$0 sm:$0xff] }
 0x132   : > { %v435_v25 = vsub.f32 %v1582_v5, %v433_v20  ;;  %484 = vadd.xlane.f32.xlu0 %v483_v24  ;;  %v438_v27 = vsel %vm424_vm0, %v436_v21, 0.0 }
 0x133   : > { %v482_v26 = vmul.f32 %v480_v23, %v480_v23 }
 0x134   : > { %v437_v28 = vmul.f32 %v435_v25, %v435_v25 }
 0x135   : > { %v486_v30 = vsel %vm424_vm0, %v482_v26, 0.0 }
 0x136   : > { %487 = vadd.xlane.f32.xlu1 %v486_v30  ;;  %439 = vadd.xlane.f32.xlu0 %v438_v27  ;;  %v441_v31 = vsel %vm424_vm0, %v437_v28, 0.0 }
 0x13a   : > { %442 = vadd.xlane.f32.xlu1 %v441_v31  ;;  %640 = vadd.xlane.f32.xlu0 %v639_v32 }
 0x13e   : > { %643 = vadd.xlane.f32.xlu1 %v642_v34 }
 0x1bf   : > { %v485_v36 = vpop.xlane.xlu0 %484 }
 0x1c0   : > { %v489_v37 = vmul.f32 0.03125, %v485_v36 }
 0x1c2   : > { %v491_v38 = vadd.f32 1e-05, %v489_v37 }
 0x1c3   : > { %v440_v39 = vpop.xlane.xlu0 %439  ;;  %v488_v40 = vpop.xlane.xlu1 %487 }
 0x1c4   : > { %1738 = vrsqrt.f32 %v491_v38  ;;  %v444_v41 = vmul.f32 0.03125, %v440_v39  ;;  %v490_v42 = vmul.f32 0.03125, %v488_v40 }
 0x1c6   : > { %v446_v43 = vadd.f32 1e-05, %v444_v41  ;;  %v492_v44 = vadd.f32 1e-05, %v490_v42 }
 0x1c7   : > { %v443_v45 = vpop.xlane.xlu1 %442  ;;  %v641_v46 = vpop.xlane.xlu0 %640 }
 0x1c8   : > { %1740 = vrsqrt.f32 %v446_v43  ;;  %v445_v47 = vmul.f32 0.03125, %v443_v45  ;;  %v645_v48 = vmul.f32 0.03125, %v641_v46 }
 0x1c9   : > { %1742 = vrsqrt.f32 %v492_v44 }
 0x1ca   : > { %v447_v49 = vadd.f32 1e-05, %v445_v47  ;;  %v647_v50 = vsub.f32 %v1589_v29, %v645_v48 }
 0x1cb   : > { %v644_v51 = vpop.xlane.xlu1 %643 }
 0x1cc   : > { %1744 = vrsqrt.f32 %v447_v49  ;;  %v646_v52 = vmul.f32 0.03125, %v644_v51  ;;  %v649_v53 = vmul.f32 %v647_v50, %v647_v50 }
 0x1ce   : > { %v1739_v54 = vpop.eup %1738  ;;  %v648_v55 = vsub.f32 %v1590_v33, %v646_v52  ;;  %v651_v56 = vsel %vm424_vm0, %v649_v53, 0.0 }
 0x1cf   : > { %652 = vadd.xlane.f32.xlu0 %v651_v56  ;;  %v495_v57 = vmul.f32 %v1739_v54, %v479_v14 }
 0x1d0   : > { %v650_v58 = vmul.f32 %v648_v55, %v648_v55 }
 0x1d1   : > { %v501_v1 = vmul.f32 %v1536_v59, %v495_v57 }
 0x1d2   : > { %v1741_v60 = vpop.eup %1740  ;;  %v654_v61 = vsel %vm424_vm0, %v650_v58, 0.0 }
 0x1d3   : > { %v1743_v62 = vpop.eup %1742  ;;  %655 = vadd.xlane.f32.xlu1 %v654_v61  ;;  %v450_v63 = vmul.f32 %v1741_v60, %v2371_v15  ;;  %v507_v7 = vadd.f32 %v1537_v2, %v501_v1 }
 0x1d4   : > { %v496_v0 = vmul.f32 %v1743_v62, %v480_v23 }
 0x1d5   : > { %v456_v9 = vmul.f32 %v1534_v3, %v450_v63 }
 0x1d6   : > { %v1745_v4 = vpop.eup %1744  ;;  %v502_v5 = vmul.f32 %v1536_v59, %v496_v0 }
 0x1d7   : > { %v451_v6 = vmul.f32 %v1745_v4, %v435_v25  ;;  %v2395_v16 = vadd.f32 %v1535_v10, %v456_v9 }
 0x1d8   : > { %v508_v8 = vadd.f32 %v1537_v2, %v502_v5 }
 0x1d9   : > { %v457_v11 = vmul.f32 %v1534_v3, %v451_v6  ;;  %v464_v17 = vmul.f32 0.17677669, %v2395_v16 }
 0x1da   : > { %v509_v12 = vpack.c.bf16 %v508_v8, %v507_v7 }
 0x1db   : > { %v2392_v13 = vadd.f32 %v1535_v10, %v457_v11 }
 0x1dc   : > { %1612 = vmatpush3.bf16.msra.mxu1 %v509_v12  ;;  %v514_v14 = vsel %vm424_vm0, %v509_v12, 0 }
 0x1dd   : > { %1606 = vmatpush3.bf16.xpose.msra.mxu0 %v514_v14  ;;  %1617 = vmatprep.subr.bf16.mxu1 %v2064_v35  ;;  %v465_v15 = vmul.f32 0.17677669, %v2392_v13 }
 0x1de   : > { %1623 = vmatprep.subr.bf16.mxu0 %v2064_v35 }
 0x1df   : > { %v466_v18 = vpack.c.bf16 %v465_v15, %v464_v17 }
 0x1e4   : > { %1608 = vmatmul.mubr.msk.bf16.vlgmr.msra.gmra.mrb[0].mxu0 %vm424_vm0, %v466_v18 }
 0x1e5   : > { %1625 = vmatprep.mubr.msk.bf16.mxu0 %vm2065_vm1, %v2064_v35 }
 0x25c   : > { %v653_v19 = vpop.xlane.xlu0 %652 }
 0x25d   : > { %v657_v20 = vmul.f32 0.03125, %v653_v19 }
 0x25f   : > { %v659_v21 = vadd.f32 1e-05, %v657_v20 }
 0x260   : > { %v656_v22 = vpop.xlane.xlu1 %655 }
 0x261   : > { %1746 = vrsqrt.f32 %v659_v21  ;;  %v658_v23 = vmul.f32 0.03125, %v656_v22 }
 0x263   : > { %v660_v24 = vadd.f32 1e-05, %v658_v23 }
 0x265   : > { %1748 = vrsqrt.f32 %v660_v24 }
 0x26b   : > { %v1747_v25 = vpop.eup %1746 }
 0x26c   : > { %v663_v26 = vmul.f32 %v1747_v25, %v647_v50 }
 0x26e   : > { %v665_v27 = vmul.f32 %v1536_v59, %v663_v26 }
 0x26f   : > { %v1749_v28 = vpop.eup %1748 }
 0x270   : > { %v664_v29 = vmul.f32 %v1749_v28, %v648_v55  ;;  %v667_v31 = vadd.f32 %v1537_v2, %v665_v27 }
 0x272   : > { %v666_v30 = vmul.f32 %v1536_v59, %v664_v29 }
 0x274   : > { %v668_v32 = vadd.f32 %v1537_v2, %v666_v30 }
 0x276   : > { %v669_v33 = vpack.c.bf16 %v668_v32, %v667_v31 }
 0x278   : > { %1624 = vmatpush3.bf16.msra.mxu0 %v669_v33  ;;  %v671_v52 = vsel %vm424_vm0, %v669_v33, 0 }
 0x279   : > { %1635 = vmatprep.subr.bf16.mxu0 %v2064_v35 }
 0x2b7   : > { %v550_v34 = vpop.f32.mrb[0].mxu0 }
 0x2b8   : > { %v1609_v36 = vpop.f32.mrb[1].mxu0  ;;  %v558_v37 = vsel %vm557_vm2, %v550_v34, -inf }
 0x2b9   : > { %559 = vmax.xlane.f32.xlu0 %v558_v37  ;;  %v553_v38 = vpop.f32.mrb[2].mxu0 }
 0x2ba   : > { %v1610_v39 = vpop.f32.mrb[3].mxu0  ;;  %v561_v40 = vsel %vm557_vm2, %v553_v38, -inf }
 0x2bb   : > { %562 = vmax.xlane.f32.xlu1 %v561_v40 }
 0x346   : > { %v560_v41 = vpop.xlane.xlu0 %559 }
 0x347   : > { %v564_v42 = vmax.f32 %v560_v41, -1e+30 }
 0x348   : > { %v563_v43 = vpop.xlane.xlu1 %562 }
 0x349   : > { %v572_v44 = vsub.f32 %v550_v34, %v564_v42  ;;  %v565_v45 = vmax.f32 %v563_v43, -1e+30  ;;  %v566_v1 = vsub.f32 -1e+30, %v564_v42 }
 0x34b   : > { %v574_v46 = vmul.f32 1.442695, %v572_v44  ;;  %v573_v47 = vsub.f32 %v553_v38, %v565_v45  ;;  %v567_v2 = vsub.f32 -1e+30, %v565_v45  ;;  %v568_v3 = vmul.f32 1.442695, %v566_v1 }
 0x34d   : > { %v576_v48 = vmul.f32 1.442695, %v573_v47  ;;  %1750 = vpow2.f32 %v574_v46  ;;  %v570_v4 = vmul.f32 1.442695, %v567_v2  ;;  %v1551_v2 = vld [vmem:[#allocation8 + $0x13] ss:$0 sm:$0xff] }
 0x34f   : > { %1752 = vpow2.f32 %v576_v48 }
 0x350   : > { %1754 = vpow2.f32 %v568_v3 }
 0x351   : > { %1756 = vpow2.f32 %v570_v4 }
 0x357   : > { %v1751_v49 = vpop.eup %1750 }
 0x358   : > { %v580_v63 = vsel %vm557_vm2, %v1751_v49, 0.0 }
 0x359   : > { %v1753_v50 = vpop.eup %1752 }
 0x35a   : > { %v588_v51 = vpack.c.bf16 %v1753_v50, %v1751_v49  ;;  %v583_v0 = vsel %vm557_vm2, %v1753_v50, 0.0  ;;  %v1755_v19 = vpop.eup %1754  ;;  %v1542_v50 = vld [vmem:[#allocation8 + $0x10] ss:$0 sm:$0xff] }
 0x35b   : > { %v1757_v20 = vpop.eup %1756  ;;  %v578_v21 = vmul.f32 0.0, %v1755_v19 }
 0x35c   : > { %1614 = vmatmul.mubr.msk.bf16.vlgmr.msra.gmra.mrb[0].mxu1 %vm557_vm2, %v588_v51  ;;  %v579_v23 = vmul.f32 0.0, %v1757_v20 }
 0x35d   : > { %1618 = vmatpush3.bf16.xpose.msra.mxu1 %v671_v52  ;;  %1619 = vmatprep.mubr.msk.bf16.mxu1 %vm2065_vm1, %v2064_v35 }
 0x35e   : > { %1629 = vmatprep.subr.bf16.mxu1 %v2064_v35 }
 0x364   : > { %1620 = vmatmul.mubr.msk.bf16.vlgmr.msra.gmra.mrb[4].mxu1 %vm424_vm0, %v466_v18 }
 0x365   : > { %1631 = vmatprep.mubr.msk.bf16.mxu1 %vm2065_vm1, %v2064_v35 }
 0x42f   : > { %v626_v53 = vpop.f32.mrb[0].mxu1 }
 0x430   : > { %v1615_v54 = vpop.f32.mrb[1].mxu1  ;;  %v633_v22 = vadd.f32 %v626_v53, %v578_v21 }
 0x431   : > { %v629_v55 = vpop.f32.mrb[2].mxu1 }
 0x432   : > { %v1616_v56 = vpop.f32.mrb[3].mxu1  ;;  %v634_v26 = vadd.f32 %v629_v55, %v579_v23  ;;  %v1545_v55 = vld [vmem:[#allocation8 + $0x11] ss:$0 sm:$0xff] }
 0x437   : > { %v707_v57 = vpop.f32.mrb[4].mxu1 }
 0x438   : > { %v1621_v58 = vpop.f32.mrb[5].mxu1  ;;  %v714_v59 = vsel %vm557_vm2, %v707_v57, -inf }
 0x439   : > { %715 = vmax.xlane.f32.xlu0 %v714_v59  ;;  %v710_v60 = vpop.f32.mrb[6].mxu1 }
 0x43a   : > { %v1622_v61 = vpop.f32.mrb[7].mxu1  ;;  %v717_v62 = vsel %vm557_vm2, %v710_v60, -inf }
 0x43b   : > { %718 = vmax.xlane.f32.xlu1 %v717_v62  ;;  %v1548_v61 = vld [vmem:[#allocation8 + $0x12] ss:$0 sm:$0xff] }
 0x43d   : > { %581 = vadd.xlane.f32.xlu0 %v580_v63 }
 0x43f   : > { %584 = vadd.xlane.f32.xlu1 %v583_v0 }
 0x4c6   : > { %v716_v5 = vpop.xlane.xlu0 %715 }
 0x4c7   : > { %v720_v6 = vmax.f32 %v564_v42, %v716_v5 }
 0x4c8   : > { %v719_v7 = vpop.xlane.xlu1 %718 }
 0x4c9   : > { %v722_v8 = vsub.f32 %v564_v42, %v720_v6  ;;  %v728_v9 = vsub.f32 %v707_v57, %v720_v6  ;;  %v721_v10 = vmax.f32 %v565_v45, %v719_v7 }
 0x4ca   : > { %v582_v34 = vpop.xlane.xlu0 %581 }
 0x4cb   : > { %v724_v11 = vmul.f32 1.442695, %v722_v8  ;;  %v730_v12 = vmul.f32 1.442695, %v728_v9  ;;  %v723_v14 = vsub.f32 %v565_v45, %v721_v10  ;;  %v729_v15 = vsub.f32 %v710_v60, %v721_v10 }
 0x4cc   : > { %v585_v36 = vpop.xlane.xlu1 %584  ;;  %v586_v37 = vadd.f32 %v582_v34, %v578_v21 }
 0x4cd   : > { %1758 = vpow2.f32 %v724_v11  ;;  %v726_v17 = vmul.f32 1.442695, %v723_v14  ;;  %v732_v18 = vmul.f32 1.442695, %v729_v15  ;;  %v587_v39 = vadd.f32 %v585_v36, %v579_v23  ;;  %v1549_v23 = vld [vmem:[#allocation8 + $0x16] ss:$0 sm:$0xff] }
 0x4ce   : > { %1760 = vpow2.f32 %v730_v12  ;;  %v2066_v11 = vmov 0   ;;  %v1543_v12 = vld [vmem:[#allocation8 + $0x14] ss:$0 sm:$0xff] }
 0x4cf   : > { %1762 = vpow2.f32 %v726_v17  ;;  %1735 = vset.pattern.permute.xlu0 %v2066_v11  ;;  %1736 = vset.pattern.permute.xlu1 %v2066_v11  ;;  %v1547_v11 = vld [vmem:[#allocation8 + $0x19] ss:$0 sm:$0xff] }
 0x4d0   : > { %1764 = vpow2.f32 %v732_v18  ;;  %v1546_v18 = vld [vmem:[#allocation8 + $0x15] ss:$0 sm:$0xff] }
 0x4d7   : > { %v1759_v24 = vpop.eup %1758 }
 0x4d8   : > { %v1761_v25 = vpop.eup %1760  ;;  %v744_v27 = vmul.f32 %v1759_v24, %v633_v22  ;;  %v734_v40 = vmul.f32 %v1759_v24, %v586_v37 }
 0x4d9   : > { %v1763_v28 = vpop.eup %1762  ;;  %v736_v29 = vsel %vm557_vm2, %v1761_v25, 0.0 }
 0x4da   : > { %v1765_v30 = vpop.eup %1764  ;;  %737 = vadd.xlane.f32.xlu0 %v736_v29  ;;  %v745_v31 = vmul.f32 %v1763_v28, %v634_v26  ;;  %v735_v43 = vmul.f32 %v1763_v28, %v587_v39  ;;  %v1552_v28 = vld [vmem:[#allocation8 + $0x17] ss:$0 sm:$0xff] }
 0x4db   : > { %v739_v32 = vsel %vm557_vm2, %v1765_v30, 0.0  ;;  %v746_v33 = vpack.c.bf16 %v1765_v30, %v1761_v25 }
 0x4dc   : > { %740 = vadd.xlane.f32.xlu1 %v739_v32 }
 0x4dd   : > { %1626 = vmatmul.mubr.msk.bf16.vlgmr.msra.gmra.mrb[4].mxu0 %vm557_vm2, %v746_v33 }
 0x4de   : > { %1637 = vmatprep.mubr.msk.bf16.mxu0 %vm2065_vm1, %v2064_v35 }
 0x567   : > { %v738_v38 = vpop.xlane.xlu0 %737 }
 0x568   : > { %v742_v42 = vadd.f32 %v738_v38, %v734_v40 }
 0x569   : > { %v741_v41 = vpop.xlane.xlu1 %740 }
 0x56a   : > { %v743_v44 = vadd.f32 %v741_v41, %v735_v43  ;;  %1766 = vrcp.f32 %v742_v42 }
 0x56c   : > { %1768 = vrcp.f32 %v743_v44 }
 0x574   : > { %v1767_v48 = vpop.eup %1766 }
 0x576   : > { %v1769_v54 = vpop.eup %1768 }
 0x5b0   : > { %v784_v45 = vpop.f32.mrb[4].mxu0 }
 0x5b1   : > { %v791_v46 = vadd.f32 %v784_v45, %v744_v27  ;;  %v1627_v47 = vpop.f32.mrb[5].mxu0 }
 0x5b2   : > { %v787_v49 = vpop.f32.mrb[6].mxu0 }
 0x5b3   : > { %v797_v51 = vmul.f32 %v1767_v48, %v791_v46  ;;  %v792_v52 = vadd.f32 %v787_v49, %v745_v31  ;;  %v1628_v53 = vpop.f32.mrb[7].mxu0 }
 0x5b5   : > { %v798_v56 = vmul.f32 %v1769_v54, %v792_v52  ;;  %v805_v57 = vmul.f32 %v1542_v50, %v797_v51  ;;  %v854_v60 = vmul.f32 %v1545_v55, %v797_v51  ;;  %v903_v1 = vmul.f32 %v1548_v61, %v797_v51 }
 0x5b6   : > { %v952_v6 = vmul.f32 %v1551_v2, %v797_v51 }
 0x5b7   : > { %v807_v58 = vsel %vm424_vm0, %v805_v57, 0.0  ;;  %v806_v59 = vmul.f32 %v1542_v50, %v798_v56  ;;  %v855_v63 = vmul.f32 %v1545_v55, %v798_v56  ;;  %v856_v0 = vsel %vm424_vm0, %v854_v60, 0.0 }
 0x5b8   : > { %808 = vadd.xlane.f32.xlu0 %v807_v58  ;;  %v904_v4 = vmul.f32 %v1548_v61, %v798_v56  ;;  %v905_v5 = vsel %vm424_vm0, %v903_v1, 0.0  ;;  %v953_v8 = vmul.f32 %v1551_v2, %v798_v56  ;;  %v954_v9 = vsel %vm424_vm0, %v952_v6, 0.0 }
 0x5b9   : > { %v810_v62 = vsel %vm424_vm0, %v806_v59, 0.0  ;;  %v859_v3 = vsel %vm424_vm0, %v855_v63, 0.0 }
 0x5ba   : > { %811 = vadd.xlane.f32.xlu1 %v810_v62  ;;  %v908_v7 = vsel %vm424_vm0, %v904_v4, 0.0  ;;  %v957_v10 = vsel %vm424_vm0, %v953_v8, 0.0 }
 0x5bc   : > { %857 = vadd.xlane.f32.xlu0 %v856_v0 }
 0x5be   : > { %860 = vadd.xlane.f32.xlu1 %v859_v3 }
 0x5c0   : > { %906 = vadd.xlane.f32.xlu0 %v905_v5 }
 0x5c2   : > { %909 = vadd.xlane.f32.xlu1 %v908_v7 }
 0x5c4   : > { %955 = vadd.xlane.f32.xlu0 %v954_v9 }
 0x5c6   : > { %958 = vadd.xlane.f32.xlu1 %v957_v10 }
 0x645   : > { %v809_v14 = vpop.xlane.xlu0 %808 }
 0x646   : > { %v817_v15 = vadd.f32 %v1543_v12, %v809_v14  ;;  %v1544_v14 = vld [vmem:[#allocation8 + $0x18] ss:$0 sm:$0xff] }
 0x647   : > { %v812_v17 = vpop.xlane.xlu1 %811 }
 0x648   : > { %v821_v19 = vmul.f32 0.70710677, %v817_v15  ;;  %v818_v25 = vadd.f32 %v1543_v12, %v812_v17  ;;  %v819_v38 = vmul.f32 0.5, %v817_v15  ;;  %v1550_v17 = vld [vmem:[#allocation8 + $0x1a] ss:$0 sm:$0xff] }
 0x649   : > { %v858_v20 = vpop.xlane.xlu0 %857 }
 0x64a   : > { %1770 = verf.f32 %v821_v19  ;;  %v866_v21 = vadd.f32 %v1546_v18, %v858_v20  ;;  %v822_v30 = vmul.f32 0.70710677, %v818_v25  ;;  %v820_v62 = vmul.f32 0.5, %v818_v25 }
 0x64b   : > { %v861_v22 = vpop.xlane.xlu1 %860 }
 0x64c   : > { %v870_v24 = vmul.f32 0.70710677, %v866_v21  ;;  %v867_v33 = vadd.f32 %v1546_v18, %v861_v22  ;;  %v868_v45 = vmul.f32 0.5, %v866_v21  ;;  %v1553_v22 = vld [vmem:[#allocation8 + $0x1b] ss:$0 sm:$0xff] }
 0x64d   : > { %v907_v26 = vpop.xlane.xlu0 %906 }
 0x64e   : > { %1772 = verf.f32 %v870_v24  ;;  %v915_v27 = vadd.f32 %v1549_v23, %v907_v26  ;;  %v871_v40 = vmul.f32 0.70710677, %v867_v33  ;;  %v869_v2 = vmul.f32 0.5, %v867_v33 }
 0x64f   : > { %v910_v31 = vpop.xlane.xlu1 %909 }
 0x650   : > { %v919_v29 = vmul.f32 0.70710677, %v915_v27  ;;  %v916_v41 = vadd.f32 %v1549_v23, %v910_v31  ;;  %v917_v51 = vmul.f32 0.5, %v915_v27  ;;  %v1554_v27 = vld [vmem:[#allocation8 + $0x8] ss:$0 sm:$0xff] }
 0x651   : > { %v956_v32 = vpop.xlane.xlu0 %955 }
 0x652   : > { %1774 = verf.f32 %v919_v29  ;;  %v964_v34 = vadd.f32 %v1552_v28, %v956_v32  ;;  %v920_v47 = vmul.f32 0.70710677, %v916_v41  ;;  %v918_v6 = vmul.f32 0.5, %v916_v41 }
 0x653   : > { %1776 = verf.f32 %v822_v30  ;;  %v959_v42 = vpop.xlane.xlu1 %958 }
 0x654   : > { %v1771_v36 = vpop.eup %1770  ;;  %v968_v37 = vmul.f32 0.70710677, %v964_v34  ;;  %v965_v48 = vadd.f32 %v1552_v28, %v959_v42  ;;  %v966_v57 = vmul.f32 0.5, %v964_v34 }
 0x655   : > { %v825_v39 = vadd.f32 1.0, %v1771_v36 }
 0x656   : > { %1778 = verf.f32 %v968_v37  ;;  %v969_v53 = vmul.f32 0.70710677, %v965_v48  ;;  %v967_v9 = vmul.f32 0.5, %v965_v48 }
 0x657   : > { %v827_v43 = vmul.f32 %v825_v39, %v819_v38  ;;  %1780 = verf.f32 %v871_v40 }
 0x658   : > { %v1773_v44 = vpop.eup %1772  ;;  %1782 = verf.f32 %v920_v47 }
 0x659   : > { %v874_v46 = vadd.f32 1.0, %v1773_v44  ;;  %832 = vperm.xlu0 %1735, %v827_v43   ;;  %1784 = verf.f32 %v969_v53 }
 0x65b   : > { %v876_v49 = vmul.f32 %v874_v46, %v868_v45 }
 0x65c   : > { %v1775_v50 = vpop.eup %1774 }
 0x65d   : > { %v923_v52 = vadd.f32 1.0, %v1775_v50  ;;  %881 = vperm.xlu1 %1736, %v876_v49   ;;  %v1777_v54 = vpop.eup %1776 }
 0x65e   : > { %v826_v59 = vadd.f32 1.0, %v1777_v54 }
 0x65f   : > { %v925_v55 = vmul.f32 %v923_v52, %v917_v51 }
 0x660   : > { %v1779_v56 = vpop.eup %1778  ;;  %v828_v0 = vmul.f32 %v826_v59, %v820_v62 }
 0x661   : > { %v972_v58 = vadd.f32 1.0, %v1779_v56  ;;  %930 = vperm.xlu1 %1736, %v925_v55   ;;  %v1781_v61 = vpop.eup %1780 }
 0x662   : > { %v875_v63 = vadd.f32 1.0, %v1781_v61  ;;  %v1783_v1 = vpop.eup %1782 }
 0x663   : > { %v974_v60 = vmul.f32 %v972_v58, %v966_v57  ;;  %v924_v3 = vadd.f32 1.0, %v1783_v1  ;;  %v1785_v5 = vpop.eup %1784 }
 0x664   : > { %v877_v4 = vmul.f32 %v875_v63, %v869_v2  ;;  %v973_v7 = vadd.f32 1.0, %v1785_v5  ;;  %v1555_v63 = vld [vmem:[#allocation8 + $0x4] ss:$0 sm:$0xff] }
 0x665   : > { %979 = vperm.xlu1 %1736, %v974_v60   ;;  %v926_v8 = vmul.f32 %v924_v3, %v918_v6  ;;  %v1556_v3 = vld [vmem:[#allocation8 + $0x5] ss:$0 sm:$0xff] }
 0x666   : > { %v975_v10 = vmul.f32 %v973_v7, %v967_v9 }
 0x669   : > { %837 = vperm.xlu1 %1736, %v828_v0  }
 0x66d   : > { %886 = vperm.xlu1 %1736, %v877_v4  }
 0x671   : > { %935 = vperm.xlu1 %1736, %v926_v8  }
 0x675   : > { %984 = vperm.xlu1 %1736, %v975_v10  }
 0x6d8   : > { %v833_v15 = vpop.permute.xlu0 %832 }
 0x6d9   : > { %v844_v20 = vmul.f32 %v1544_v14, %v833_v15 }
 0x6dc   : > { %v882_v12 = vpop.permute.xlu1 %881 }
 0x6dd   : > { %v893_v18 = vmul.f32 %v1547_v11, %v882_v12 }
 0x6df   : > { %v895_v23 = vadd.f32 %v893_v18, %v844_v20 }
 0x6e0   : > { %v931_v19 = vpop.permute.xlu1 %930 }
 0x6e1   : > { %v942_v21 = vmul.f32 %v1550_v17, %v931_v19 }
 0x6e3   : > { %v944_v25 = vadd.f32 %v942_v21, %v895_v23 }
 0x6e4   : > { %v980_v24 = vpop.permute.xlu1 %979 }
 0x6e5   : > { %v991_v26 = vmul.f32 %v1553_v22, %v980_v24 }
 0x6e7   : > { %v993_v28 = vadd.f32 %v991_v26, %v944_v25 }
 0x6e8   : > { %v838_v29 = vpop.permute.xlu1 %837 }
 0x6e9   : > { %v2432_v30 = vadd.f32 %v1554_v27, %v993_v28  ;;  %v845_v36 = vmul.f32 %v1544_v14, %v838_v29 }
 0x6eb   : > { %v1001_v31 = vsel %vm424_vm0, %v2432_v30, 0.0 }
 0x6ec   : > { %1002 = vadd.xlane.f32.xlu1 %v1001_v31  ;;  %v887_v32 = vpop.permute.xlu1 %886  ;;  %v1737_v31 = vld [vmem:[%s2611_s4] sm:$0xff]  }
 0x6ed   : > { %v894_v33 = vmul.f32 %v1547_v11, %v887_v32  ;;  %v1193_v32 = vsel %vm424_vm0, %v1737_v31, 0 }
 0x6ef   : > { %v896_v38 = vadd.f32 %v894_v33, %v845_v36 }
 0x6f0   : > { %v936_v34 = vpop.permute.xlu1 %935 }
 0x6f1   : > { %v943_v37 = vmul.f32 %v1550_v17, %v936_v34 }
 0x6f3   : > { %v945_v40 = vadd.f32 %v943_v37, %v896_v38  ;;  %v1559_v37 = vld [vmem:[#allocation8 + $0x6] ss:$0 sm:$0xff] }
 0x6f4   : > { %v985_v39 = vpop.permute.xlu1 %984 }
 0x6f5   : > { %v992_v41 = vmul.f32 %v1553_v22, %v985_v39 }
 0x6f7   : > { %v994_v42 = vadd.f32 %v992_v41, %v945_v40 }
 0x6f9   : > { %v2436_v43 = vadd.f32 %v1554_v27, %v994_v42 }
 0x6fb   : > { %v1004_v44 = vsel %vm424_vm0, %v2436_v43, 0.0 }
 0x6fc   : > { %1005 = vadd.xlane.f32.xlu0 %v1004_v44 }
 0x779   : > { %v1003_v45 = vpop.xlane.xlu1 %1002 }
 0x77a   : > { %v1007_v46 = vmul.f32 0.03125, %v1003_v45 }
 0x77c   : > { %v1009_v47 = vsub.f32 %v2432_v30, %v1007_v46 }
 0x77e   : > { %v1011_v48 = vmul.f32 %v1009_v47, %v1009_v47 }
 0x780   : > { %v1013_v49 = vsel %vm424_vm0, %v1011_v48, 0.0 }
 0x781   : > { %1014 = vadd.xlane.f32.xlu0 %v1013_v49 }
 0x789   : > { %v1006_v50 = vpop.xlane.xlu0 %1005 }
 0x78a   : > { %v1008_v51 = vmul.f32 0.03125, %v1006_v50 }
 0x78c   : > { %v1010_v52 = vsub.f32 %v2436_v43, %v1008_v51 }
 0x78e   : > { %v1012_v53 = vmul.f32 %v1010_v52, %v1010_v52 }
 0x790   : > { %v1016_v54 = vsel %vm424_vm0, %v1012_v53, 0.0 }
 0x791   : > { %1017 = vadd.xlane.f32.xlu1 %v1016_v54 }
 0x80e   : > { %v1015_v55 = vpop.xlane.xlu0 %1014 }
 0x80f   : > { %v1019_v56 = vmul.f32 0.03125, %v1015_v55 }
 0x811   : > { %v1021_v57 = vadd.f32 1e-05, %v1019_v56 }
 0x813   : > { %1786 = vrsqrt.f32 %v1021_v57 }
 0x81d   : > { %v1787_v61 = vpop.eup %1786 }
 0x81e   : > { %v1018_v58 = vpop.xlane.xlu1 %1017  ;;  %v1025_v62 = vmul.f32 %v1787_v61, %v1009_v47  ;;  %v1560_v47 = vld [vmem:[#allocation8 + $0x7] ss:$0 sm:$0xff] }
 0x81f   : > { %v1020_v59 = vmul.f32 0.03125, %v1018_v58 }
 0x820   : > { %v1031_v2 = vmul.f32 %v1555_v63, %v1025_v62 }
 0x821   : > { %v1022_v60 = vadd.f32 1e-05, %v1020_v59 }
 0x822   : > { %v1037_v5 = vadd.f32 %v1556_v3, %v1031_v2 }
 0x823   : > { %1788 = vrsqrt.f32 %v1022_v60 }
 0x824   : > { %v1040_v10 = vmul.f32 0.17677669, %v1037_v5 }
 0x82d   : > { %v1789_v0 = vpop.eup %1788 }
 0x82e   : > { %v1026_v1 = vmul.f32 %v1789_v0, %v1010_v52 }
 0x830   : > { %v1032_v4 = vmul.f32 %v1555_v63, %v1026_v1 }
 0x832   : > { %v1038_v6 = vadd.f32 %v1556_v3, %v1032_v4 }
 0x834   : > { %v1039_v7 = vpack.c.bf16 %v1038_v6, %v1037_v5  ;;  %v1041_v9 = vmul.f32 0.17677669, %v1038_v6 }
 0x836   : > { %1636 = vmatpush3.bf16.msra.mxu0 %v1039_v7  ;;  %v1047_v8 = vsel %vm424_vm0, %v1039_v7, 0  ;;  %v1042_v11 = vpack.c.bf16 %v1041_v9, %v1040_v10 }
 0x837   : > { %1630 = vmatpush3.bf16.xpose.msra.mxu1 %v1047_v8 }
 0x838   : > { %1641 = vmatprep.subr.bf16.mxu1 %v2064_v35 }
 0x83e   : > { %1632 = vmatmul.mubr.msk.bf16.vlgmr.msra.gmra.mrb[8].mxu1 %vm424_vm0, %v1042_v11 }
 0x83f   : > { %1643 = vmatprep.mubr.msk.bf16.mxu1 %vm2065_vm1, %v2064_v35  ;;  %1642 = vmatpush3.bf16.xpose.msra.mxu1 %v1193_v32 }
 0x911   : > { %v1083_v12 = vpop.f32.mrb[8].mxu1 }
 0x912   : > { %v1633_v14 = vpop.f32.mrb[9].mxu1  ;;  %v1090_v15 = vsel %vm557_vm2, %v1083_v12, -inf }
 0x913   : > { %1091 = vmax.xlane.f32.xlu0 %v1090_v15  ;;  %v1086_v17 = vpop.f32.mrb[10].mxu1  ;;  %v418_v15 = vld [vmem:[#allocation8 + $0xa] sm:$0x1] }
 0x914   : > { %v1634_v18 = vpop.f32.mrb[11].mxu1  ;;  %v1093_v19 = vsel %vm557_vm2, %v1086_v17, -inf }
 0x915   : > { %1094 = vmax.xlane.f32.xlu1 %v1093_v19 }
 0x9a0   : > { %v1092_v20 = vpop.xlane.xlu0 %1091 }
 0x9a1   : > { %v1096_v21 = vsub.f32 %v1083_v12, %v1092_v20 }
 0x9a2   : > { %v1095_v22 = vpop.xlane.xlu1 %1094 }
 0x9a3   : > { %v1098_v23 = vmul.f32 1.442695, %v1096_v21  ;;  %v1097_v24 = vsub.f32 %v1086_v17, %v1095_v22 }
 0x9a5   : > { %1790 = vpow2.f32 %v1098_v23  ;;  %v1100_v25 = vmul.f32 1.442695, %v1097_v24 }
 0x9a7   : > { %1792 = vpow2.f32 %v1100_v25 }
 0x9af   : > { %v1791_v26 = vpop.eup %1790 }
 0x9b0   : > { %v1147_v35 = vsel %vm557_vm2, %v1791_v26, 0.0 }
 0x9b1   : > { %v1793_v27 = vpop.eup %1792  ;;  %1148 = vadd.xlane.f32.xlu0 %v1147_v35 }
 0x9b2   : > { %v1150_v28 = vsel %vm557_vm2, %v1793_v27, 0.0  ;;  %v1102_v29 = vpack.c.bf16 %v1793_v27, %v1791_v26 }
 0x9b3   : > { %1151 = vadd.xlane.f32.xlu1 %v1150_v28 }
 0x9b4   : > { %1638 = vmatmul.mubr.msk.bf16.vlgmr.msra.gmra.mrb[8].mxu0 %vm557_vm2, %v1102_v29 }
 0xa3e   : > { %v1149_v33 = vpop.xlane.xlu0 %1148 }
 0xa3f   : > { %1794 = vrcp.f32 %v1149_v33 }
 0xa40   : > { %v1152_v34 = vpop.xlane.xlu1 %1151 }
 0xa41   : > { %1796 = vrcp.f32 %v1152_v34 }
 0xa49   : > { %v1795_v36 = vpop.eup %1794 }
 0xa4b   : > { %v1797_v41 = vpop.eup %1796 }
 0xa87   : > { %v1140_v38 = vpop.f32.mrb[8].mxu0 }
 0xa88   : > { %v1157_v39 = vmul.f32 %v1795_v36, %v1140_v38  ;;  %v1639_v40 = vpop.f32.mrb[9].mxu0 }
 0xa89   : > { %v1143_v42 = vpop.f32.mrb[10].mxu0 }
 0xa8a   : > { %v1163_v44 = vmul.f32 %v1559_v37, %v1157_v39  ;;  %v1158_v45 = vmul.f32 %v1797_v41, %v1143_v42  ;;  %v1640_v46 = vpop.f32.mrb[11].mxu0 }
 0xa8c   : > { %v1165_v48 = vadd.f32 %v1163_v44, %v2432_v30  ;;  %v1164_v49 = vmul.f32 %v1559_v37, %v1158_v45  ;;  %v1561_v30 = vld [vmem:[#allocation8 + $0x9] ss:$0 sm:$0xff] }
 0xa8e   : > { %v1171_v50 = vmul.f32 %v1560_v47, %v1165_v48  ;;  %v1166_v51 = vadd.f32 %v1164_v49, %v2436_v43 }
 0xa90   : > { %v1173_v52 = vadd.f32 %v1171_v50, %v2395_v16  ;;  %v1172_v53 = vmul.f32 %v1560_v47, %v1166_v51 }
 0xa92   : > { %v1174_v54 = vadd.f32 %v1172_v53, %v2392_v13  ;;  %1175 = vst.msk [vmem:[%s2465_s27] sm:$0xff] %vm424_vm0, %v1173_v52 }
 0xa94   : > { %v1177_v55 = vpack.c.bf16 %v1174_v54, %v1173_v52  ;;  %1176 = vst.msk [vmem:[%s2465_s27 + $0x8] sm:$0xff] %vm424_vm0, %v1174_v54 }
 0xa96   : > { %1644 = vmatmul.mubr.msk.bf16.vlgmr.msra.gmra.mrb[12].mxu1 %vm424_vm0, %v1177_v55 }
 0xb69   : > { %v1229_v56 = vpop.f32.mrb[12].mxu1 }
 0xb6a   : > { %v1230_v43 = vadd.f32 %v1561_v30, %v1229_v56  ;;  %v1645_v57 = vpop.f32.mrb[13].mxu1 }
 0xb6b   : > { %v1232_v16 = vpop.f32.mrb[14].mxu1 }
 0xb6c   : > { %v1233_v58 = vadd.f32 %v1561_v30, %v1232_v16  ;;  %v1646_v13 = vpop.f32.mrb[15].mxu1  ;;  %v1236_v59 = vmul.f32 %v1230_v43, %v1230_v43 }
 0xb6e   : > { %v1238_v60 = vsel %vm557_vm2, %v1236_v59, 0.0  ;;  %v1237_v61 = vmul.f32 %v1233_v58, %v1233_v58 }
 0xb6f   : > { %1239 = vadd.xlane.f32.xlu0 %v1238_v60 }
 0xb70   : > { %v1241_v62 = vsel %vm557_vm2, %v1237_v61, 0.0 }
 0xb71   : > { %1242 = vadd.xlane.f32.xlu1 %v1241_v62 }
 0xbfc   : > { %v1240_v63 = vpop.xlane.xlu0 %1239 }
 0xbfd   : > { %1798 = vrsqrt.f32 %v1240_v63 }
 0xbfe   : > { %v1243_v0 = vpop.xlane.xlu1 %1242 }
 0xbff   : > { %1800 = vrsqrt.f32 %v1243_v0 }
 0xc07   : > { %v1799_v1 = vpop.eup %1798 }
 0xc08   : > { %v1246_v2 = vmul.f32 %v1799_v1, %v1230_v43 }
 0xc09   : > { %v1801_v3 = vpop.eup %1800 }
 0xc0a   : > { %v1247_v4 = vmul.f32 %v1801_v3, %v1233_v58  ;;  %1248 = vst.msk [vmem:[%s399_s11] sm:$0xff] %vm557_vm2, %v1246_v2  ;;  %v1250_v5 = vsel %vm557_vm2, %v1246_v2, 0.0 }
 0xc0c   : > { %v1251_v6 = vsel %vm557_vm2, %v1247_v4, 0.0  ;;  %1249 = vst.msk [vmem:[%s399_s11 + $0x8] sm:$0xff] %vm557_vm2, %v1247_v4 }
 0xc0d   : > { %v1252_v7 = vadd.f32 %v1251_v6, %v1250_v5 }
 0xc0f   : > { %v1253_v8 = vrot.slane %v1252_v7, 4 }
 0xc11   : > { %v1254_v9 = vadd.f32 %v1253_v8, %v1252_v7 }
 0xc13   : > { %v1255_v10 = vrot.slane %v1254_v9, 2 }
 0xc15   : > { %v1256_v11 = vadd.f32 %v1255_v10, %v1254_v9 }
 0xc17   : > { %v1257_v12 = vrot.slane %v1256_v11, 1 }
 0xc19   : > { %v1258_v14 = vadd.f32 %v1257_v12, %v1256_v11 }
 0xc1b   : > { %v1260_v17 = vmul.f32 0.0625, %v1258_v14 }
 0xc1d   : > { %v1261_v18 = vmul.f32 %v1260_v17, %v418_v15 }
 0xc1f   : > { %v1263_v19 = vsel %vm1262_vm3, %v1261_v18, 0.0 }
 0xc20   : > { %1264 = vadd.xlane.f32.xlu0 %v1263_v19 }
 0xc21   : > { %1933 = shalt.err (!%p1930_p11)
}
 0xc22   : > { %s1934_s24 = scalar_lea.hbm %s2486_s23, 256  ;;  %s1938_s13 = scalar_lea.hbm %s2666_s8, 512 }
 0xc23   : > { %p1935_p0 = scmp.ne.s32.totalorder %s2486_s23, %s1934_s24  ;;  %p1939_p10 = scmp.lt.u32.totalorder %s2486_s23, %s2666_s8 }
 0xc24   : > { %p1940_p1 = scmp.lt.u32.totalorder %s1938_s13, %s1934_s24  ;;  %p1942_p4 = scmp.lt.u32.totalorder %s1934_s24, %s2486_s23 }
 0xc25   : > { %p1936_p13 = pnand %p1935_p0, %p2667_p9 }
 0xc26   : > { %p1941_p2 = por %p1940_p1, %p1939_p10 }
 0xc27   : > { %p1937_p8 = pneg %p1936_p13 }
 0xc28   : > { %p1943_p12 = por %p1942_p4, %p1941_p2 }
 0xc2a   : > { %p1944_p6 = pnand %p1943_p12, %p1937_p8 }
 0xc2c   : > { %1947 = shalt.err (!%p1944_p6)
}
 0xc2d   : > { %s2068_s6 = smov 128   ;;  %s2069_s7 = smov 8  }
 0xc2e   : > { %1660 = dma.vmem_to_hbm [thread:$0]  (%p2667_p9), %s2488_s30, 256, %s2486_s23, %s2492_s1, %s2068_s6, %s2068_s6, %s2069_s7  }
 0xc2f   : > { %s2668_s9 = sld [smem:[#allocation25_spill]]  ;;  %s1297_s20 = sshll.u32 %s2465_s27, 4  ;;  %s2527_s20 = int_to_ptr.vmem [resolvable:$true] %s1297_s20 }
 0xc30   : > { %s1274_s15 = scalar_lea.sflag [#allocation4], %s2343_s21  ;;  %s1948_s12 = scalar_lea.vmem %s2527_s20, 256 }
 0xc31   : > { %p1949_p3 = scmp.ne.s32.totalorder %s2527_s20, %s1948_s12  ;;  %s2070_s24 = smov [#allocation10]  }
 0xc32   : > { %s1952_s30 = sshll.u32 %s2070_s24, 4  ;;  %s1953_s30 = int_to_ptr.vmem [resolvable:$false] %s1952_s30 }
 0xc33   : > { %p1950_p5 = pnand %p1949_p3, %p2667_p9  ;;  %s1954_s23 = scalar_lea.vmem %s1953_s30, 512 }
 0xc34   : > { %p1955_p11 = scmp.lt.s32.totalorder %s2527_s20, %s1953_s30  ;;  %p1956_p0 = scmp.lt.s32.totalorder %s1954_s23, %s1948_s12 }
 0xc35   : > { %s2524_s10 = scalar_lea.hbm %s2668_s9, %s1577_s18  ;;  %p1951_p7 = pneg %p1950_p5 }
 0xc36   : > { %p1957_p13 = por %p1956_p0, %p1955_p11 }
 0xc38   : > { %p1958_p8 = pnand %p1957_p13, %p1951_p7 }
 0xc3a   : > { %1961 = shalt.err (!%p1958_p8)
}
 0xc3b   : > { %s1962_s27 = scalar_lea.hbm %s2524_s10, 256  ;;  %s1966_s19 = scalar_lea.hbm %s2668_s9, 512 }
 0xc3c   : > { %p1963_p10 = scmp.ne.s32.totalorder %s2524_s10, %s1962_s27  ;;  %p1967_p4 = scmp.lt.u32.totalorder %s2524_s10, %s2668_s9 }
 0xc3d   : > { %p1968_p12 = scmp.lt.u32.totalorder %s1966_s19, %s1962_s27  ;;  %p1970_p3 = scmp.lt.u32.totalorder %s1962_s27, %s2524_s10 }
 0xc3e   : > { %p1964_p1 = pnand %p1963_p10, %p2667_p9 }
 0xc3f   : > { %p1969_p6 = por %p1968_p12, %p1967_p4 }
 0xc40   : > { %p1965_p2 = pneg %p1964_p1 }
 0xc41   : > { %p1971_p5 = por %p1970_p3, %p1969_p6 }
 0xc43   : > { %p1972_p7 = pnand %p1971_p5, %p1965_p2 }
 0xc45   : > { %1975 = shalt.err (!%p1972_p7)
}
 0xc46   : > { %1659 = dma.vmem_to_hbm [thread:$0]  (%p2667_p9), %s2527_s20, 256, %s2524_s10, %s1274_s15, %s2068_s6, %s2068_s6, %s2069_s7   ;;  %v419_v20 = vld [vmem:[#allocation8 + $0xb] sm:$0x1] }
 0xc47   : > { %s406_s14 = scalar_lea.vmem [#allocation13], %s2346_s17  ;;  %s1571_s22 = sshll.u32 %s2205_s29, 7 }
 0xc48   : > { %s1329_s11 = sshll.u32 %s406_s14, 4  ;;  %s2669_s30 = sld [smem:[#allocation27_spill]]  ;;  %s2558_s11 = int_to_ptr.vmem [resolvable:$true] %s1329_s11 }
 0xc49   : > { %s1976_s6 = scalar_lea.vmem %s2558_s11, 128  ;;  %s2071_s17 = smov [#allocation13]  }
 0xc4a   : > { %p1977_p11 = scmp.ne.s32.totalorder %s2558_s11, %s1976_s6  ;;  %s1980_s29 = sshll.u32 %s2071_s17, 4  ;;  %s1981_s29 = int_to_ptr.vmem [resolvable:$false] %s1980_s29 }
 0xc4b   : > { %s1982_s7 = scalar_lea.vmem %s1981_s29, 256  ;;  %p1983_p8 = scmp.lt.s32.totalorder %s2558_s11, %s1981_s29 }
 0xc4c   : > { %p1978_p0 = pnand %p1977_p11, %p2667_p9  ;;  %p1984_p10 = scmp.lt.s32.totalorder %s1982_s7, %s1976_s6 }
 0xc4e   : > { %s2563_s23 = scalar_lea.hbm %s2669_s30, %s1571_s22  ;;  %p1979_p13 = pneg %p1978_p0 }
 0xc4f   : > { %p1985_p1 = por %p1984_p10, %p1983_p8 }
 0xc51   : > { %p1986_p2 = pnand %p1985_p1, %p1979_p13 }
 0xcad   : > { %v1265_v21 = vpop.xlane.xlu0 %1264 }
 0xcae   : > { %v1266_v22 = vadd.f32 %v1265_v21, %v419_v20 }
 0xcb0   : > { %1647 = vpush %v1266_v22 }
 0xce1   : > { %s1648_s12 = spop %1647 }
 0xce2   : > { %v1269_v23 = vstv %s1648_s12 }
 0xce3   : > { %1272 = vst [vmem:[%s406_s14] sm:$0xff] %v1269_v23 }
 0xce4   : > { %1989 = shalt.err (!%p1986_p2)
}
 0xce5   : > { %s1990_s10 = scalar_lea.hbm %s2563_s23, 128  ;;  %s1994_s27 = scalar_lea.hbm %s2669_s30, 256 }
 0xce6   : > { %p1991_p4 = scmp.ne.s32.totalorder %s2563_s23, %s1990_s10  ;;  %p1995_p3 = scmp.lt.u32.totalorder %s2563_s23, %s2669_s30 }
 0xce7   : > { %p1996_p5 = scmp.lt.u32.totalorder %s1994_s27, %s1990_s10  ;;  %p1998_p11 = scmp.lt.u32.totalorder %s1990_s10, %s2563_s23 }
 0xce8   : > { %p1992_p12 = pnand %p1991_p4, %p2667_p9 }
 0xce9   : > { %p1997_p7 = por %p1996_p5, %p1995_p3 }
 0xcea   : > { %p1993_p6 = pneg %p1992_p12 }
 0xceb   : > { %p1999_p0 = por %p1998_p11, %p1997_p7 }
 0xced   : > { %p2000_p13 = pnand %p1999_p0, %p1993_p6 }
 0xcef   : > { %2003 = shalt.err (!%p2000_p13)
}
 0xcf0   : > { %1661 = dma.vmem_to_hbm [thread:$0]  (%p2667_p9), %s2558_s11, 128, %s2563_s23, %s2492_s1  }
 0xcf1 PF: > { %s2670_s19 = sld [smem:[#allocation19_spill]]  ;;  %s2671_s13 = sld [smem:[#allocation23_spill]] }
 0xcf2   : > { %s2672_s5 = sld [smem:[#allocation20_spill]] }
 0xcf7   : > { %s1341_s14 = sand.u32 1, %s2670_s19   ;;  %p2673_p8 = scmp.ne.s32.totalorder %s2671_s13, 0 }
 0xcf8   : > { %p2674_p10 = scmp.ge.s32.totalorder %s2672_s5, 2  ;;  %s1342_s22 = scalar_lea.sflag [#allocation4], %s1341_s14 }
 0xcfa   : > { %p1680_p1 = pnand %p2674_p10, %p2673_p8 }
 0xcfc   : > { %2033 = dma.done.wait (!%p1680_p1), %s1342_s22, 256  }
 0xcfd   : > { %2035 = vsyncadd (!%p1680_p1), %s1342_s22, 4294967040  ;;  %s2675_s12 = sadd.s32 4294967294, %s2672_s5  }
 0xcfe   : > { %s1350_s21 = sand.u32 1, %s2675_s12  }
 0xcff   : > { %s1351_s24 = scalar_lea.sflag [#allocation12], %s1350_s21 }
 0xd00   : > { %2037 = dma.done.wait (!%p1680_p1), %s1351_s24, 384  }
 0xd01   : > { %2039 = vsyncadd (!%p1680_p1), %s1351_s24, 4294966912  ;;  %s2676_s27 = sld [smem:[#allocation21_spill]]  ;;  %s2677_s16 = sld [smem:[#allocation22_spill]] }
 0xd02   : > { %s2678_s24 = smov %s2046_s25  ;;  %s2679_s25 = smov %s2050_s26 }
 0xd07   : > { %p28_p9 = scmp.ge.s32.totalorder %s2676_s27, 4   ;;  %s2680_s26 = smov %s2677_s16 }
 0xd09   :  { %30 = sbr.rel (!%p28_p9) target bundleno = 15 (0xf), region = 145 }
 0xd10   :  { %1365 = vsyncpa [#allocation3], 1 }
 0xd11   :  { %1367 = vsyncpa [#allocation3 + $0x1], 1 }
 0xd12   :  { %1368 = vsyncpa [#allocation6], 1 }
 0xd13   :  { %1370 = vsyncpa [#allocation6 + $0x1], 1 }
 0xd14   :  { %1371 = vsyncpa [#allocation9], 1 }
 0xd15   :  { %1372 = vsyncpa [#allocation4], 1 }
 0xd16   :  { %1374 = vsyncpa [#allocation4 + $0x1], 1 }
 0xd17   :  { %1375 = vsyncpa [#allocation12], 1 }
 0xd18   :  { %1377 = vsyncpa [#allocation12 + $0x1], 1 }

</bundles_post_ra>
